<compile_context>
chip_gen: v7x
topology: tpu7x:2x2x1
jax: 0.10.0
libtpu: 0.0.40
codegen_flags: <defaults>
</compile_context>

<pallas_src>
import math
import functools

import jax
import jax.numpy as jnp
from jax.experimental import pallas as pl
from jax.experimental.pallas import tpu as pltpu


def _gather_rows_kernel(ids_ref, valid_ref, w_hbm, o_ref, sem, *,
                        tokens_per_block, embedding_dim):
    """Gather `tokens_per_block` embedding rows straight from HBM into the
    (tokens_per_block, embedding_dim) output tile via per-row DMAs."""
    tm = tokens_per_block
    base = pl.program_id(0) * tm

    # Issue one (1, D) HBM -> output-tile row DMA per token; all tm copies stay
    # in flight on a shared DMA semaphore (identical descriptor sizes).
    for j in range(tm):
        idx = ids_ref[base + j]                       # pre-clamped, always in bounds
        pltpu.make_async_copy(
            w_hbm.at[pl.ds(idx, 1), :],
            o_ref.at[pl.ds(j, 1), :],
            sem,
        ).start()

    # Read masking flags before the waits (scalar reads after a DMA wait lose
    # SMEM store->load forwarding).
    valid = [valid_ref[base + j] for j in range(tm)]

    # Drain: one wait per issued copy (same size, shared semaphore).
    for j in range(tm):
        pltpu.make_async_copy(
            w_hbm.at[pl.ds(0, 1), :],
            o_ref.at[pl.ds(j, 1), :],
            sem,
        ).wait()

    # Megatron masking: a globally out-of-range id produces an all-zero row
    # (every TP rank masks it, so the all-reduced row is zero).  Overwrite the
    # gathered dummy row instead of multiplying by a 0/1 mask.
    zero_row = jnp.zeros((1, embedding_dim), dtype=o_ref.dtype)
    for j in range(tm):
        @pl.when(valid[j] == 0)
        def _(j=j):
            o_ref[pl.ds(j, 1), :] = zero_row


def vocab_parallel_embedding(input_ids, weight, *, world_size=1,
                             tokens_per_block=64):
    """input_ids: int (batch, seq); weight: (num_embeddings, embedding_dim).

    `world_size` is kept for API parity with the module; on a single device the
    per-partition masked gathers + all-reduce are mathematically identical to a
    single full-vocab gather, so no partition loop is needed.
    """
    num_embeddings, embedding_dim = weight.shape
    assert num_embeddings % world_size == 0   # Megatron splits the vocab evenly

    batch, seq = input_ids.shape
    n_tok = batch * seq

    # Lane-dense output / full-width row DMAs: pad the embedding dim to a
    # multiple of 128 once (sliced off at the end if needed).
    d_pad = ((embedding_dim + 127) // 128) * 128
    w = weight
    if d_pad != embedding_dim:
        w = jnp.pad(w, ((0, 0), (0, d_pad - embedding_dim)))

    # Token-block size: large enough to amortize per-grid-step overhead, shrunk
    # for tiny inputs so tail padding (and the post-kernel slice) disappears.
    tm = max(8, (int(tokens_per_block) // 8) * 8)
    if n_tok <= tm:
        tm = max(8, ((n_tok + 7) // 8) * 8)
    n_blocks = pl.cdiv(n_tok, tm)
    n_tok_pad = n_blocks * tm

    ids = input_ids.reshape(n_tok).astype(jnp.int32)
    valid = jnp.logical_and(ids >= 0, ids < num_embeddings).astype(jnp.int32)
    ids_clamped = jnp.clip(ids, 0, num_embeddings - 1)   # DMA always in bounds
    if n_tok_pad != n_tok:
        pad = n_tok_pad - n_tok
        ids_clamped = jnp.pad(ids_clamped, (0, pad))
        valid = jnp.pad(valid, (0, pad))                  # padded rows -> zeros

    kernel = functools.partial(_gather_rows_kernel,
                               tokens_per_block=tm, embedding_dim=d_pad)

    itemsize = jnp.dtype(w.dtype).itemsize
    tile_bytes = tm * d_pad * itemsize
    # Double-buffered output tile + slack; stays well inside v7x's 64 MiB VMEM
    # while allowing bigger tiles on v5e/v6e.
    vmem_limit = int(min(max(4 * tile_bytes + (1 << 20), 16 << 20), 48 << 20))

    out = pl.pallas_call(
        kernel,
        out_shape=jax.ShapeDtypeStruct((n_tok_pad, d_pad), w.dtype),
        grid_spec=pltpu.PrefetchScalarGridSpec(
            num_scalar_prefetch=2,                       # clamped ids + valid flags
            grid=(n_blocks,),
            in_specs=[pl.BlockSpec(memory_space=pl.ANY)],  # weight stays in HBM
            out_specs=pl.BlockSpec((tm, d_pad), lambda i, ids, valid: (i, 0)),
            scratch_shapes=[pltpu.SemaphoreType.DMA],
        ),
        compiler_params=pltpu.CompilerParams(
            # token blocks are independent -> shard across TensorCores on v7x
            dimension_semantics=("parallel",),
            vmem_limit_bytes=vmem_limit,
        ),
    )(ids_clamped, valid, w)

    if n_tok_pad != n_tok:
        out = out[:n_tok]
    if d_pad != embedding_dim:
        out = out[:, :embedding_dim]
    return out.reshape(batch, seq, embedding_dim)


def _xavier_normal(key, shape, dtype=jnp.float32):
    # torch.nn.init.xavier_normal_ on (fan_out, fan_in) = (num_embeddings, embedding_dim)
    fan_out, fan_in = shape
    std = math.sqrt(2.0 / (fan_in + fan_out))
    return std * jax.random.normal(key, shape, dtype=dtype)


if __name__ == "__main__":
    key = jax.random.PRNGKey(0)
    k_w, k_idx, k_idx2 = jax.random.split(key, 3)

    # small, module-consistent shapes
    num_embeddings = 512      # vocabulary size (divisible by world_size)
    embedding_dim = 128       # hidden size
    world_size = 2            # simulated tensor-model-parallel group
    batch, seq = 2, 8

    # Deterministic full "master weight" (xavier_normal_), matching
    # _initialize_affine_weight_cpu's master-weight construction.
    weight = _xavier_normal(k_w, (num_embeddings, embedding_dim))
    input_ids = jax.random.randint(k_idx, (batch, seq), 0, num_embeddings,
                                   dtype=jnp.int32)

    out = vocab_parallel_embedding(input_ids, weight, world_size=world_size)
    out = jax.block_until_ready(out)

    # pure-JAX reference: full-vocab gather == sum of per-partition masked gathers
    ref = jnp.take(weight, input_ids.reshape(-1), axis=0).reshape(
        batch, seq, embedding_dim)
    assert out.shape == (batch, seq, embedding_dim)
    assert jnp.allclose(out, ref, atol=1e-6, rtol=1e-6)

    # multi-block grid path (2 token blocks of 8)
    out_mb = jax.block_until_ready(
        vocab_parallel_embedding(input_ids, weight, world_size=world_size,
                                 tokens_per_block=8))
    assert jnp.allclose(out_mb, ref, atol=1e-6, rtol=1e-6)

    # padded-tail path (15 tokens, block of 8 -> padded to 16 then trimmed)
    ids_odd = jax.random.randint(k_idx2, (3, 5), 0, num_embeddings, dtype=jnp.int32)
    out_odd = jax.block_until_ready(
        vocab_parallel_embedding(ids_odd, weight, world_size=world_size,
                                 tokens_per_block=8))
    ref_odd = jnp.take(weight, ids_odd.reshape(-1), axis=0).reshape(3, 5, embedding_dim)
    assert jnp.allclose(out_odd, ref_odd, atol=1e-6, rtol=1e-6)

    # Megatron masking semantics: a globally out-of-range id produces an
    # all-zero embedding row after the (simulated) all-reduce.
    bad_ids = input_ids.at[0, 0].set(num_embeddings)   # id outside the vocab
    out_bad = jax.block_until_ready(
        vocab_parallel_embedding(bad_ids, weight, world_size=world_size))
    assert jnp.allclose(out_bad[0, 0], 0.0)
    assert jnp.allclose(out_bad[0, 1:], ref[0, 1:], atol=1e-6, rtol=1e-6)

    # TODO(synk): args.embed_layernorm LayerNorm branch not modeled (disabled by
    # default in Megatron args); the cross-device all-reduce is collapsed into
    # the single-device full-vocab gather since each in-range id is owned by
    # exactly one tensor-parallel rank.
    print("KERNEL_OK")
</pallas_src>

<mosaic_0001>
module attributes {stable_mosaic.version = 11 : i64} {
  func.func @_gather_rows_kernel(%arg0: i32, %arg1: memref<16xi32, #tpu.memory_space<smem>>, %arg2: memref<16xi32, #tpu.memory_space<smem>>, %arg3: memref<512x128xf32, #tpu.memory_space<any>>, %arg4: memref<16x128xf32, #tpu.memory_space<vmem>>, %arg5: memref<!tpu.dma_semaphore, #tpu.memory_space<semaphore_mem>>) attributes {dimension_semantics = [#tpu.dimension_semantics<parallel>], iteration_bounds = array<i64: 1>, scalar_prefetch = 2 : i64, scratch_operands = 1 : i64, tpu.core_type = #tpu.core_type<tc>, window_params = [{}, {transform_indices = @transform_1, window_bounds = array<i64: 16, 128>}]} {
    %c16_i32 = arith.constant 16 : i32
    %0 = arith.muli %arg0, %c16_i32 : i32
    %c0_i32 = arith.constant 0 : i32
    %1 = arith.addi %0, %c0_i32 : i32
    %2 = arith.index_cast %1 : i32 to index
    %3 = memref.load %arg1[%2] : memref<16xi32, #tpu.memory_space<smem>>
    %c0_i32_0 = arith.constant 0 : i32
    %4 = tpu.memref_slice %arg3[%3, %c0_i32_0] : memref<512x128xf32, #tpu.memory_space<any>> -> memref<1x128xf32, #tpu.memory_space<any>>
    %c0_i32_1 = arith.constant 0 : i32
    %c0_i32_2 = arith.constant 0 : i32
    %5 = tpu.memref_slice %arg4[%c0_i32_1, %c0_i32_2] : memref<16x128xf32, #tpu.memory_space<vmem>> -> memref<1x128xf32, #tpu.memory_space<vmem>>
    tpu.enqueue_dma source(%4 : memref<1x128xf32, #tpu.memory_space<any>>) target(%5 : memref<1x128xf32, #tpu.memory_space<vmem>>) target_semaphore(%arg5 : memref<!tpu.dma_semaphore, #tpu.memory_space<semaphore_mem>>)
    %c1_i32 = arith.constant 1 : i32
    %6 = arith.addi %0, %c1_i32 : i32
    %7 = arith.index_cast %6 : i32 to index
    %8 = memref.load %arg1[%7] : memref<16xi32, #tpu.memory_space<smem>>
    %c0_i32_3 = arith.constant 0 : i32
    %9 = tpu.memref_slice %arg3[%8, %c0_i32_3] : memref<512x128xf32, #tpu.memory_space<any>> -> memref<1x128xf32, #tpu.memory_space<any>>
    %c1_i32_4 = arith.constant 1 : i32
    %c0_i32_5 = arith.constant 0 : i32
    %10 = tpu.memref_slice %arg4[%c1_i32_4, %c0_i32_5] : memref<16x128xf32, #tpu.memory_space<vmem>> -> memref<1x128xf32, #tpu.memory_space<vmem>>
    tpu.enqueue_dma source(%9 : memref<1x128xf32, #tpu.memory_space<any>>) target(%10 : memref<1x128xf32, #tpu.memory_space<vmem>>) target_semaphore(%arg5 : memref<!tpu.dma_semaphore, #tpu.memory_space<semaphore_mem>>)
    %c2_i32 = arith.constant 2 : i32
    %11 = arith.addi %0, %c2_i32 : i32
    %12 = arith.index_cast %11 : i32 to index
    %13 = memref.load %arg1[%12] : memref<16xi32, #tpu.memory_space<smem>>
    %c0_i32_6 = arith.constant 0 : i32
    %14 = tpu.memref_slice %arg3[%13, %c0_i32_6] : memref<512x128xf32, #tpu.memory_space<any>> -> memref<1x128xf32, #tpu.memory_space<any>>
    %c2_i32_7 = arith.constant 2 : i32
    %c0_i32_8 = arith.constant 0 : i32
    %15 = tpu.memref_slice %arg4[%c2_i32_7, %c0_i32_8] : memref<16x128xf32, #tpu.memory_space<vmem>> -> memref<1x128xf32, #tpu.memory_space<vmem>>
    tpu.enqueue_dma source(%14 : memref<1x128xf32, #tpu.memory_space<any>>) target(%15 : memref<1x128xf32, #tpu.memory_space<vmem>>) target_semaphore(%arg5 : memref<!tpu.dma_semaphore, #tpu.memory_space<semaphore_mem>>)
    %c3_i32 = arith.constant 3 : i32
    %16 = arith.addi %0, %c3_i32 : i32
    %17 = arith.index_cast %16 : i32 to index
    %18 = memref.load %arg1[%17] : memref<16xi32, #tpu.memory_space<smem>>
    %c0_i32_9 = arith.constant 0 : i32
    %19 = tpu.memref_slice %arg3[%18, %c0_i32_9] : memref<512x128xf32, #tpu.memory_space<any>> -> memref<1x128xf32, #tpu.memory_space<any>>
    %c3_i32_10 = arith.constant 3 : i32
    %c0_i32_11 = arith.constant 0 : i32
    %20 = tpu.memref_slice %arg4[%c3_i32_10, %c0_i32_11] : memref<16x128xf32, #tpu.memory_space<vmem>> -> memref<1x128xf32, #tpu.memory_space<vmem>>
    tpu.enqueue_dma source(%19 : memref<1x128xf32, #tpu.memory_space<any>>) target(%20 : memref<1x128xf32, #tpu.memory_space<vmem>>) target_semaphore(%arg5 : memref<!tpu.dma_semaphore, #tpu.memory_space<semaphore_mem>>)
    %c4_i32 = arith.constant 4 : i32
    %21 = arith.addi %0, %c4_i32 : i32
    %22 = arith.index_cast %21 : i32 to index
    %23 = memref.load %arg1[%22] : memref<16xi32, #tpu.memory_space<smem>>
    %c0_i32_12 = arith.constant 0 : i32
    %24 = tpu.memref_slice %arg3[%23, %c0_i32_12] : memref<512x128xf32, #tpu.memory_space<any>> -> memref<1x128xf32, #tpu.memory_space<any>>
    %c4_i32_13 = arith.constant 4 : i32
    %c0_i32_14 = arith.constant 0 : i32
    %25 = tpu.memref_slice %arg4[%c4_i32_13, %c0_i32_14] : memref<16x128xf32, #tpu.memory_space<vmem>> -> memref<1x128xf32, #tpu.memory_space<vmem>>
    tpu.enqueue_dma source(%24 : memref<1x128xf32, #tpu.memory_space<any>>) target(%25 : memref<1x128xf32, #tpu.memory_space<vmem>>) target_semaphore(%arg5 : memref<!tpu.dma_semaphore, #tpu.memory_space<semaphore_mem>>)
    %c5_i32 = arith.constant 5 : i32
    %26 = arith.addi %0, %c5_i32 : i32
    %27 = arith.index_cast %26 : i32 to index
    %28 = memref.load %arg1[%27] : memref<16xi32, #tpu.memory_space<smem>>
    %c0_i32_15 = arith.constant 0 : i32
    %29 = tpu.memref_slice %arg3[%28, %c0_i32_15] : memref<512x128xf32, #tpu.memory_space<any>> -> memref<1x128xf32, #tpu.memory_space<any>>
    %c5_i32_16 = arith.constant 5 : i32
    %c0_i32_17 = arith.constant 0 : i32
    %30 = tpu.memref_slice %arg4[%c5_i32_16, %c0_i32_17] : memref<16x128xf32, #tpu.memory_space<vmem>> -> memref<1x128xf32, #tpu.memory_space<vmem>>
    tpu.enqueue_dma source(%29 : memref<1x128xf32, #tpu.memory_space<any>>) target(%30 : memref<1x128xf32, #tpu.memory_space<vmem>>) target_semaphore(%arg5 : memref<!tpu.dma_semaphore, #tpu.memory_space<semaphore_mem>>)
    %c6_i32 = arith.constant 6 : i32
    %31 = arith.addi %0, %c6_i32 : i32
    %32 = arith.index_cast %31 : i32 to index
    %33 = memref.load %arg1[%32] : memref<16xi32, #tpu.memory_space<smem>>
    %c0_i32_18 = arith.constant 0 : i32
    %34 = tpu.memref_slice %arg3[%33, %c0_i32_18] : memref<512x128xf32, #tpu.memory_space<any>> -> memref<1x128xf32, #tpu.memory_space<any>>
    %c6_i32_19 = arith.constant 6 : i32
    %c0_i32_20 = arith.constant 0 : i32
    %35 = tpu.memref_slice %arg4[%c6_i32_19, %c0_i32_20] : memref<16x128xf32, #tpu.memory_space<vmem>> -> memref<1x128xf32, #tpu.memory_space<vmem>>
    tpu.enqueue_dma source(%34 : memref<1x128xf32, #tpu.memory_space<any>>) target(%35 : memref<1x128xf32, #tpu.memory_space<vmem>>) target_semaphore(%arg5 : memref<!tpu.dma_semaphore, #tpu.memory_space<semaphore_mem>>)
    %c7_i32 = arith.constant 7 : i32
    %36 = arith.addi %0, %c7_i32 : i32
    %37 = arith.index_cast %36 : i32 to index
    %38 = memref.load %arg1[%37] : memref<16xi32, #tpu.memory_space<smem>>
    %c0_i32_21 = arith.constant 0 : i32
    %39 = tpu.memref_slice %arg3[%38, %c0_i32_21] : memref<512x128xf32, #tpu.memory_space<any>> -> memref<1x128xf32, #tpu.memory_space<any>>
    %c7_i32_22 = arith.constant 7 : i32
    %c0_i32_23 = arith.constant 0 : i32
    %40 = tpu.memref_slice %arg4[%c7_i32_22, %c0_i32_23] : memref<16x128xf32, #tpu.memory_space<vmem>> -> memref<1x128xf32, #tpu.memory_space<vmem>>
    tpu.enqueue_dma source(%39 : memref<1x128xf32, #tpu.memory_space<any>>) target(%40 : memref<1x128xf32, #tpu.memory_space<vmem>>) target_semaphore(%arg5 : memref<!tpu.dma_semaphore, #tpu.memory_space<semaphore_mem>>)
    %c8_i32 = arith.constant 8 : i32
    %41 = arith.addi %0, %c8_i32 : i32
    %42 = arith.index_cast %41 : i32 to index
    %43 = memref.load %arg1[%42] : memref<16xi32, #tpu.memory_space<smem>>
    %c0_i32_24 = arith.constant 0 : i32
    %44 = tpu.memref_slice %arg3[%43, %c0_i32_24] : memref<512x128xf32, #tpu.memory_space<any>> -> memref<1x128xf32, #tpu.memory_space<any>>
    %c8_i32_25 = arith.constant 8 : i32
    %c0_i32_26 = arith.constant 0 : i32
    %45 = tpu.memref_slice %arg4[%c8_i32_25, %c0_i32_26] : memref<16x128xf32, #tpu.memory_space<vmem>> -> memref<1x128xf32, #tpu.memory_space<vmem>>
    tpu.enqueue_dma source(%44 : memref<1x128xf32, #tpu.memory_space<any>>) target(%45 : memref<1x128xf32, #tpu.memory_space<vmem>>) target_semaphore(%arg5 : memref<!tpu.dma_semaphore, #tpu.memory_space<semaphore_mem>>)
    %c9_i32 = arith.constant 9 : i32
    %46 = arith.addi %0, %c9_i32 : i32
    %47 = arith.index_cast %46 : i32 to index
    %48 = memref.load %arg1[%47] : memref<16xi32, #tpu.memory_space<smem>>
    %c0_i32_27 = arith.constant 0 : i32
    %49 = tpu.memref_slice %arg3[%48, %c0_i32_27] : memref<512x128xf32, #tpu.memory_space<any>> -> memref<1x128xf32, #tpu.memory_space<any>>
    %c9_i32_28 = arith.constant 9 : i32
    %c0_i32_29 = arith.constant 0 : i32
    %50 = tpu.memref_slice %arg4[%c9_i32_28, %c0_i32_29] : memref<16x128xf32, #tpu.memory_space<vmem>> -> memref<1x128xf32, #tpu.memory_space<vmem>>
    tpu.enqueue_dma source(%49 : memref<1x128xf32, #tpu.memory_space<any>>) target(%50 : memref<1x128xf32, #tpu.memory_space<vmem>>) target_semaphore(%arg5 : memref<!tpu.dma_semaphore, #tpu.memory_space<semaphore_mem>>)
    %c10_i32 = arith.constant 10 : i32
    %51 = arith.addi %0, %c10_i32 : i32
    %52 = arith.index_cast %51 : i32 to index
    %53 = memref.load %arg1[%52] : memref<16xi32, #tpu.memory_space<smem>>
    %c0_i32_30 = arith.constant 0 : i32
    %54 = tpu.memref_slice %arg3[%53, %c0_i32_30] : memref<512x128xf32, #tpu.memory_space<any>> -> memref<1x128xf32, #tpu.memory_space<any>>
    %c10_i32_31 = arith.constant 10 : i32
    %c0_i32_32 = arith.constant 0 : i32
    %55 = tpu.memref_slice %arg4[%c10_i32_31, %c0_i32_32] : memref<16x128xf32, #tpu.memory_space<vmem>> -> memref<1x128xf32, #tpu.memory_space<vmem>>
    tpu.enqueue_dma source(%54 : memref<1x128xf32, #tpu.memory_space<any>>) target(%55 : memref<1x128xf32, #tpu.memory_space<vmem>>) target_semaphore(%arg5 : memref<!tpu.dma_semaphore, #tpu.memory_space<semaphore_mem>>)
    %c11_i32 = arith.constant 11 : i32
    %56 = arith.addi %0, %c11_i32 : i32
    %57 = arith.index_cast %56 : i32 to index
    %58 = memref.load %arg1[%57] : memref<16xi32, #tpu.memory_space<smem>>
    %c0_i32_33 = arith.constant 0 : i32
    %59 = tpu.memref_slice %arg3[%58, %c0_i32_33] : memref<512x128xf32, #tpu.memory_space<any>> -> memref<1x128xf32, #tpu.memory_space<any>>
    %c11_i32_34 = arith.constant 11 : i32
    %c0_i32_35 = arith.constant 0 : i32
    %60 = tpu.memref_slice %arg4[%c11_i32_34, %c0_i32_35] : memref<16x128xf32, #tpu.memory_space<vmem>> -> memref<1x128xf32, #tpu.memory_space<vmem>>
    tpu.enqueue_dma source(%59 : memref<1x128xf32, #tpu.memory_space<any>>) target(%60 : memref<1x128xf32, #tpu.memory_space<vmem>>) target_semaphore(%arg5 : memref<!tpu.dma_semaphore, #tpu.memory_space<semaphore_mem>>)
    %c12_i32 = arith.constant 12 : i32
    %61 = arith.addi %0, %c12_i32 : i32
    %62 = arith.index_cast %61 : i32 to index
    %63 = memref.load %arg1[%62] : memref<16xi32, #tpu.memory_space<smem>>
    %c0_i32_36 = arith.constant 0 : i32
    %64 = tpu.memref_slice %arg3[%63, %c0_i32_36] : memref<512x128xf32, #tpu.memory_space<any>> -> memref<1x128xf32, #tpu.memory_space<any>>
    %c12_i32_37 = arith.constant 12 : i32
    %c0_i32_38 = arith.constant 0 : i32
    %65 = tpu.memref_slice %arg4[%c12_i32_37, %c0_i32_38] : memref<16x128xf32, #tpu.memory_space<vmem>> -> memref<1x128xf32, #tpu.memory_space<vmem>>
    tpu.enqueue_dma source(%64 : memref<1x128xf32, #tpu.memory_space<any>>) target(%65 : memref<1x128xf32, #tpu.memory_space<vmem>>) target_semaphore(%arg5 : memref<!tpu.dma_semaphore, #tpu.memory_space<semaphore_mem>>)
    %c13_i32 = arith.constant 13 : i32
    %66 = arith.addi %0, %c13_i32 : i32
    %67 = arith.index_cast %66 : i32 to index
    %68 = memref.load %arg1[%67] : memref<16xi32, #tpu.memory_space<smem>>
    %c0_i32_39 = arith.constant 0 : i32
    %69 = tpu.memref_slice %arg3[%68, %c0_i32_39] : memref<512x128xf32, #tpu.memory_space<any>> -> memref<1x128xf32, #tpu.memory_space<any>>
    %c13_i32_40 = arith.constant 13 : i32
    %c0_i32_41 = arith.constant 0 : i32
    %70 = tpu.memref_slice %arg4[%c13_i32_40, %c0_i32_41] : memref<16x128xf32, #tpu.memory_space<vmem>> -> memref<1x128xf32, #tpu.memory_space<vmem>>
    tpu.enqueue_dma source(%69 : memref<1x128xf32, #tpu.memory_space<any>>) target(%70 : memref<1x128xf32, #tpu.memory_space<vmem>>) target_semaphore(%arg5 : memref<!tpu.dma_semaphore, #tpu.memory_space<semaphore_mem>>)
    %c14_i32 = arith.constant 14 : i32
    %71 = arith.addi %0, %c14_i32 : i32
    %72 = arith.index_cast %71 : i32 to index
    %73 = memref.load %arg1[%72] : memref<16xi32, #tpu.memory_space<smem>>
    %c0_i32_42 = arith.constant 0 : i32
    %74 = tpu.memref_slice %arg3[%73, %c0_i32_42] : memref<512x128xf32, #tpu.memory_space<any>> -> memref<1x128xf32, #tpu.memory_space<any>>
    %c14_i32_43 = arith.constant 14 : i32
    %c0_i32_44 = arith.constant 0 : i32
    %75 = tpu.memref_slice %arg4[%c14_i32_43, %c0_i32_44] : memref<16x128xf32, #tpu.memory_space<vmem>> -> memref<1x128xf32, #tpu.memory_space<vmem>>
    tpu.enqueue_dma source(%74 : memref<1x128xf32, #tpu.memory_space<any>>) target(%75 : memref<1x128xf32, #tpu.memory_space<vmem>>) target_semaphore(%arg5 : memref<!tpu.dma_semaphore, #tpu.memory_space<semaphore_mem>>)
    %c15_i32 = arith.constant 15 : i32
    %76 = arith.addi %0, %c15_i32 : i32
    %77 = arith.index_cast %76 : i32 to index
    %78 = memref.load %arg1[%77] : memref<16xi32, #tpu.memory_space<smem>>
    %c0_i32_45 = arith.constant 0 : i32
    %79 = tpu.memref_slice %arg3[%78, %c0_i32_45] : memref<512x128xf32, #tpu.memory_space<any>> -> memref<1x128xf32, #tpu.memory_space<any>>
    %c15_i32_46 = arith.constant 15 : i32
    %c0_i32_47 = arith.constant 0 : i32
    %80 = tpu.memref_slice %arg4[%c15_i32_46, %c0_i32_47] : memref<16x128xf32, #tpu.memory_space<vmem>> -> memref<1x128xf32, #tpu.memory_space<vmem>>
    tpu.enqueue_dma source(%79 : memref<1x128xf32, #tpu.memory_space<any>>) target(%80 : memref<1x128xf32, #tpu.memory_space<vmem>>) target_semaphore(%arg5 : memref<!tpu.dma_semaphore, #tpu.memory_space<semaphore_mem>>)
    %c0_i32_48 = arith.constant 0 : i32
    %81 = arith.addi %0, %c0_i32_48 : i32
    %82 = arith.index_cast %81 : i32 to index
    %83 = memref.load %arg2[%82] : memref<16xi32, #tpu.memory_space<smem>>
    %c1_i32_49 = arith.constant 1 : i32
    %84 = arith.addi %0, %c1_i32_49 : i32
    %85 = arith.index_cast %84 : i32 to index
    %86 = memref.load %arg2[%85] : memref<16xi32, #tpu.memory_space<smem>>
    %c2_i32_50 = arith.constant 2 : i32
    %87 = arith.addi %0, %c2_i32_50 : i32
    %88 = arith.index_cast %87 : i32 to index
    %89 = memref.load %arg2[%88] : memref<16xi32, #tpu.memory_space<smem>>
    %c3_i32_51 = arith.constant 3 : i32
    %90 = arith.addi %0, %c3_i32_51 : i32
    %91 = arith.index_cast %90 : i32 to index
    %92 = memref.load %arg2[%91] : memref<16xi32, #tpu.memory_space<smem>>
    %c4_i32_52 = arith.constant 4 : i32
    %93 = arith.addi %0, %c4_i32_52 : i32
    %94 = arith.index_cast %93 : i32 to index
    %95 = memref.load %arg2[%94] : memref<16xi32, #tpu.memory_space<smem>>
    %c5_i32_53 = arith.constant 5 : i32
    %96 = arith.addi %0, %c5_i32_53 : i32
    %97 = arith.index_cast %96 : i32 to index
    %98 = memref.load %arg2[%97] : memref<16xi32, #tpu.memory_space<smem>>
    %c6_i32_54 = arith.constant 6 : i32
    %99 = arith.addi %0, %c6_i32_54 : i32
    %100 = arith.index_cast %99 : i32 to index
    %101 = memref.load %arg2[%100] : memref<16xi32, #tpu.memory_space<smem>>
    %c7_i32_55 = arith.constant 7 : i32
    %102 = arith.addi %0, %c7_i32_55 : i32
    %103 = arith.index_cast %102 : i32 to index
    %104 = memref.load %arg2[%103] : memref<16xi32, #tpu.memory_space<smem>>
    %c8_i32_56 = arith.constant 8 : i32
    %105 = arith.addi %0, %c8_i32_56 : i32
    %106 = arith.index_cast %105 : i32 to index
    %107 = memref.load %arg2[%106] : memref<16xi32, #tpu.memory_space<smem>>
    %c9_i32_57 = arith.constant 9 : i32
    %108 = arith.addi %0, %c9_i32_57 : i32
    %109 = arith.index_cast %108 : i32 to index
    %110 = memref.load %arg2[%109] : memref<16xi32, #tpu.memory_space<smem>>
    %c10_i32_58 = arith.constant 10 : i32
    %111 = arith.addi %0, %c10_i32_58 : i32
    %112 = arith.index_cast %111 : i32 to index
    %113 = memref.load %arg2[%112] : memref<16xi32, #tpu.memory_space<smem>>
    %c11_i32_59 = arith.constant 11 : i32
    %114 = arith.addi %0, %c11_i32_59 : i32
    %115 = arith.index_cast %114 : i32 to index
    %116 = memref.load %arg2[%115] : memref<16xi32, #tpu.memory_space<smem>>
    %c12_i32_60 = arith.constant 12 : i32
    %117 = arith.addi %0, %c12_i32_60 : i32
    %118 = arith.index_cast %117 : i32 to index
    %119 = memref.load %arg2[%118] : memref<16xi32, #tpu.memory_space<smem>>
    %c13_i32_61 = arith.constant 13 : i32
    %120 = arith.addi %0, %c13_i32_61 : i32
    %121 = arith.index_cast %120 : i32 to index
    %122 = memref.load %arg2[%121] : memref<16xi32, #tpu.memory_space<smem>>
    %c14_i32_62 = arith.constant 14 : i32
    %123 = arith.addi %0, %c14_i32_62 : i32
    %124 = arith.index_cast %123 : i32 to index
    %125 = memref.load %arg2[%124] : memref<16xi32, #tpu.memory_space<smem>>
    %c15_i32_63 = arith.constant 15 : i32
    %126 = arith.addi %0, %c15_i32_63 : i32
    %127 = arith.index_cast %126 : i32 to index
    %128 = memref.load %arg2[%127] : memref<16xi32, #tpu.memory_space<smem>>
    %c0_i32_64 = arith.constant 0 : i32
    %c0_i32_65 = arith.constant 0 : i32
    %129 = tpu.memref_slice %arg3[%c0_i32_64, %c0_i32_65] : memref<512x128xf32, #tpu.memory_space<any>> -> memref<1x128xf32, #tpu.memory_space<any>>
    %c0_i32_66 = arith.constant 0 : i32
    %c0_i32_67 = arith.constant 0 : i32
    %130 = tpu.memref_slice %arg4[%c0_i32_66, %c0_i32_67] : memref<16x128xf32, #tpu.memory_space<vmem>> -> memref<1x128xf32, #tpu.memory_space<vmem>>
    tpu.wait_dma2 semaphore(%arg5 : memref<!tpu.dma_semaphore, #tpu.memory_space<semaphore_mem>>) src(%129 : memref<1x128xf32, #tpu.memory_space<any>>) dst(%130 : memref<1x128xf32, #tpu.memory_space<vmem>>)
    %c0_i32_68 = arith.constant 0 : i32
    %c0_i32_69 = arith.constant 0 : i32
    %131 = tpu.memref_slice %arg3[%c0_i32_68, %c0_i32_69] : memref<512x128xf32, #tpu.memory_space<any>> -> memref<1x128xf32, #tpu.memory_space<any>>
    %c1_i32_70 = arith.constant 1 : i32
    %c0_i32_71 = arith.constant 0 : i32
    %132 = tpu.memref_slice %arg4[%c1_i32_70, %c0_i32_71] : memref<16x128xf32, #tpu.memory_space<vmem>> -> memref<1x128xf32, #tpu.memory_space<vmem>>
    tpu.wait_dma2 semaphore(%arg5 : memref<!tpu.dma_semaphore, #tpu.memory_space<semaphore_mem>>) src(%131 : memref<1x128xf32, #tpu.memory_space<any>>) dst(%132 : memref<1x128xf32, #tpu.memory_space<vmem>>)
    %c0_i32_72 = arith.constant 0 : i32
    %c0_i32_73 = arith.constant 0 : i32
    %133 = tpu.memref_slice %arg3[%c0_i32_72, %c0_i32_73] : memref<512x128xf32, #tpu.memory_space<any>> -> memref<1x128xf32, #tpu.memory_space<any>>
    %c2_i32_74 = arith.constant 2 : i32
    %c0_i32_75 = arith.constant 0 : i32
    %134 = tpu.memref_slice %arg4[%c2_i32_74, %c0_i32_75] : memref<16x128xf32, #tpu.memory_space<vmem>> -> memref<1x128xf32, #tpu.memory_space<vmem>>
    tpu.wait_dma2 semaphore(%arg5 : memref<!tpu.dma_semaphore, #tpu.memory_space<semaphore_mem>>) src(%133 : memref<1x128xf32, #tpu.memory_space<any>>) dst(%134 : memref<1x128xf32, #tpu.memory_space<vmem>>)
    %c0_i32_76 = arith.constant 0 : i32
    %c0_i32_77 = arith.constant 0 : i32
    %135 = tpu.memref_slice %arg3[%c0_i32_76, %c0_i32_77] : memref<512x128xf32, #tpu.memory_space<any>> -> memref<1x128xf32, #tpu.memory_space<any>>
    %c3_i32_78 = arith.constant 3 : i32
    %c0_i32_79 = arith.constant 0 : i32
    %136 = tpu.memref_slice %arg4[%c3_i32_78, %c0_i32_79] : memref<16x128xf32, #tpu.memory_space<vmem>> -> memref<1x128xf32, #tpu.memory_space<vmem>>
    tpu.wait_dma2 semaphore(%arg5 : memref<!tpu.dma_semaphore, #tpu.memory_space<semaphore_mem>>) src(%135 : memref<1x128xf32, #tpu.memory_space<any>>) dst(%136 : memref<1x128xf32, #tpu.memory_space<vmem>>)
    %c0_i32_80 = arith.constant 0 : i32
    %c0_i32_81 = arith.constant 0 : i32
    %137 = tpu.memref_slice %arg3[%c0_i32_80, %c0_i32_81] : memref<512x128xf32, #tpu.memory_space<any>> -> memref<1x128xf32, #tpu.memory_space<any>>
    %c4_i32_82 = arith.constant 4 : i32
    %c0_i32_83 = arith.constant 0 : i32
    %138 = tpu.memref_slice %arg4[%c4_i32_82, %c0_i32_83] : memref<16x128xf32, #tpu.memory_space<vmem>> -> memref<1x128xf32, #tpu.memory_space<vmem>>
    tpu.wait_dma2 semaphore(%arg5 : memref<!tpu.dma_semaphore, #tpu.memory_space<semaphore_mem>>) src(%137 : memref<1x128xf32, #tpu.memory_space<any>>) dst(%138 : memref<1x128xf32, #tpu.memory_space<vmem>>)
    %c0_i32_84 = arith.constant 0 : i32
    %c0_i32_85 = arith.constant 0 : i32
    %139 = tpu.memref_slice %arg3[%c0_i32_84, %c0_i32_85] : memref<512x128xf32, #tpu.memory_space<any>> -> memref<1x128xf32, #tpu.memory_space<any>>
    %c5_i32_86 = arith.constant 5 : i32
    %c0_i32_87 = arith.constant 0 : i32
    %140 = tpu.memref_slice %arg4[%c5_i32_86, %c0_i32_87] : memref<16x128xf32, #tpu.memory_space<vmem>> -> memref<1x128xf32, #tpu.memory_space<vmem>>
    tpu.wait_dma2 semaphore(%arg5 : memref<!tpu.dma_semaphore, #tpu.memory_space<semaphore_mem>>) src(%139 : memref<1x128xf32, #tpu.memory_space<any>>) dst(%140 : memref<1x128xf32, #tpu.memory_space<vmem>>)
    %c0_i32_88 = arith.constant 0 : i32
    %c0_i32_89 = arith.constant 0 : i32
    %141 = tpu.memref_slice %arg3[%c0_i32_88, %c0_i32_89] : memref<512x128xf32, #tpu.memory_space<any>> -> memref<1x128xf32, #tpu.memory_space<any>>
    %c6_i32_90 = arith.constant 6 : i32
    %c0_i32_91 = arith.constant 0 : i32
    %142 = tpu.memref_slice %arg4[%c6_i32_90, %c0_i32_91] : memref<16x128xf32, #tpu.memory_space<vmem>> -> memref<1x128xf32, #tpu.memory_space<vmem>>
    tpu.wait_dma2 semaphore(%arg5 : memref<!tpu.dma_semaphore, #tpu.memory_space<semaphore_mem>>) src(%141 : memref<1x128xf32, #tpu.memory_space<any>>) dst(%142 : memref<1x128xf32, #tpu.memory_space<vmem>>)
    %c0_i32_92 = arith.constant 0 : i32
    %c0_i32_93 = arith.constant 0 : i32
    %143 = tpu.memref_slice %arg3[%c0_i32_92, %c0_i32_93] : memref<512x128xf32, #tpu.memory_space<any>> -> memref<1x128xf32, #tpu.memory_space<any>>
    %c7_i32_94 = arith.constant 7 : i32
    %c0_i32_95 = arith.constant 0 : i32
    %144 = tpu.memref_slice %arg4[%c7_i32_94, %c0_i32_95] : memref<16x128xf32, #tpu.memory_space<vmem>> -> memref<1x128xf32, #tpu.memory_space<vmem>>
    tpu.wait_dma2 semaphore(%arg5 : memref<!tpu.dma_semaphore, #tpu.memory_space<semaphore_mem>>) src(%143 : memref<1x128xf32, #tpu.memory_space<any>>) dst(%144 : memref<1x128xf32, #tpu.memory_space<vmem>>)
    %c0_i32_96 = arith.constant 0 : i32
    %c0_i32_97 = arith.constant 0 : i32
    %145 = tpu.memref_slice %arg3[%c0_i32_96, %c0_i32_97] : memref<512x128xf32, #tpu.memory_space<any>> -> memref<1x128xf32, #tpu.memory_space<any>>
    %c8_i32_98 = arith.constant 8 : i32
    %c0_i32_99 = arith.constant 0 : i32
    %146 = tpu.memref_slice %arg4[%c8_i32_98, %c0_i32_99] : memref<16x128xf32, #tpu.memory_space<vmem>> -> memref<1x128xf32, #tpu.memory_space<vmem>>
    tpu.wait_dma2 semaphore(%arg5 : memref<!tpu.dma_semaphore, #tpu.memory_space<semaphore_mem>>) src(%145 : memref<1x128xf32, #tpu.memory_space<any>>) dst(%146 : memref<1x128xf32, #tpu.memory_space<vmem>>)
    %c0_i32_100 = arith.constant 0 : i32
    %c0_i32_101 = arith.constant 0 : i32
    %147 = tpu.memref_slice %arg3[%c0_i32_100, %c0_i32_101] : memref<512x128xf32, #tpu.memory_space<any>> -> memref<1x128xf32, #tpu.memory_space<any>>
    %c9_i32_102 = arith.constant 9 : i32
    %c0_i32_103 = arith.constant 0 : i32
    %148 = tpu.memref_slice %arg4[%c9_i32_102, %c0_i32_103] : memref<16x128xf32, #tpu.memory_space<vmem>> -> memref<1x128xf32, #tpu.memory_space<vmem>>
    tpu.wait_dma2 semaphore(%arg5 : memref<!tpu.dma_semaphore, #tpu.memory_space<semaphore_mem>>) src(%147 : memref<1x128xf32, #tpu.memory_space<any>>) dst(%148 : memref<1x128xf32, #tpu.memory_space<vmem>>)
    %c0_i32_104 = arith.constant 0 : i32
    %c0_i32_105 = arith.constant 0 : i32
    %149 = tpu.memref_slice %arg3[%c0_i32_104, %c0_i32_105] : memref<512x128xf32, #tpu.memory_space<any>> -> memref<1x128xf32, #tpu.memory_space<any>>
    %c10_i32_106 = arith.constant 10 : i32
    %c0_i32_107 = arith.constant 0 : i32
    %150 = tpu.memref_slice %arg4[%c10_i32_106, %c0_i32_107] : memref<16x128xf32, #tpu.memory_space<vmem>> -> memref<1x128xf32, #tpu.memory_space<vmem>>
    tpu.wait_dma2 semaphore(%arg5 : memref<!tpu.dma_semaphore, #tpu.memory_space<semaphore_mem>>) src(%149 : memref<1x128xf32, #tpu.memory_space<any>>) dst(%150 : memref<1x128xf32, #tpu.memory_space<vmem>>)
    %c0_i32_108 = arith.constant 0 : i32
    %c0_i32_109 = arith.constant 0 : i32
    %151 = tpu.memref_slice %arg3[%c0_i32_108, %c0_i32_109] : memref<512x128xf32, #tpu.memory_space<any>> -> memref<1x128xf32, #tpu.memory_space<any>>
    %c11_i32_110 = arith.constant 11 : i32
    %c0_i32_111 = arith.constant 0 : i32
    %152 = tpu.memref_slice %arg4[%c11_i32_110, %c0_i32_111] : memref<16x128xf32, #tpu.memory_space<vmem>> -> memref<1x128xf32, #tpu.memory_space<vmem>>
    tpu.wait_dma2 semaphore(%arg5 : memref<!tpu.dma_semaphore, #tpu.memory_space<semaphore_mem>>) src(%151 : memref<1x128xf32, #tpu.memory_space<any>>) dst(%152 : memref<1x128xf32, #tpu.memory_space<vmem>>)
    %c0_i32_112 = arith.constant 0 : i32
    %c0_i32_113 = arith.constant 0 : i32
    %153 = tpu.memref_slice %arg3[%c0_i32_112, %c0_i32_113] : memref<512x128xf32, #tpu.memory_space<any>> -> memref<1x128xf32, #tpu.memory_space<any>>
    %c12_i32_114 = arith.constant 12 : i32
    %c0_i32_115 = arith.constant 0 : i32
    %154 = tpu.memref_slice %arg4[%c12_i32_114, %c0_i32_115] : memref<16x128xf32, #tpu.memory_space<vmem>> -> memref<1x128xf32, #tpu.memory_space<vmem>>
    tpu.wait_dma2 semaphore(%arg5 : memref<!tpu.dma_semaphore, #tpu.memory_space<semaphore_mem>>) src(%153 : memref<1x128xf32, #tpu.memory_space<any>>) dst(%154 : memref<1x128xf32, #tpu.memory_space<vmem>>)
    %c0_i32_116 = arith.constant 0 : i32
    %c0_i32_117 = arith.constant 0 : i32
    %155 = tpu.memref_slice %arg3[%c0_i32_116, %c0_i32_117] : memref<512x128xf32, #tpu.memory_space<any>> -> memref<1x128xf32, #tpu.memory_space<any>>
    %c13_i32_118 = arith.constant 13 : i32
    %c0_i32_119 = arith.constant 0 : i32
    %156 = tpu.memref_slice %arg4[%c13_i32_118, %c0_i32_119] : memref<16x128xf32, #tpu.memory_space<vmem>> -> memref<1x128xf32, #tpu.memory_space<vmem>>
    tpu.wait_dma2 semaphore(%arg5 : memref<!tpu.dma_semaphore, #tpu.memory_space<semaphore_mem>>) src(%155 : memref<1x128xf32, #tpu.memory_space<any>>) dst(%156 : memref<1x128xf32, #tpu.memory_space<vmem>>)
    %c0_i32_120 = arith.constant 0 : i32
    %c0_i32_121 = arith.constant 0 : i32
    %157 = tpu.memref_slice %arg3[%c0_i32_120, %c0_i32_121] : memref<512x128xf32, #tpu.memory_space<any>> -> memref<1x128xf32, #tpu.memory_space<any>>
    %c14_i32_122 = arith.constant 14 : i32
    %c0_i32_123 = arith.constant 0 : i32
    %158 = tpu.memref_slice %arg4[%c14_i32_122, %c0_i32_123] : memref<16x128xf32, #tpu.memory_space<vmem>> -> memref<1x128xf32, #tpu.memory_space<vmem>>
    tpu.wait_dma2 semaphore(%arg5 : memref<!tpu.dma_semaphore, #tpu.memory_space<semaphore_mem>>) src(%157 : memref<1x128xf32, #tpu.memory_space<any>>) dst(%158 : memref<1x128xf32, #tpu.memory_space<vmem>>)
    %c0_i32_124 = arith.constant 0 : i32
    %c0_i32_125 = arith.constant 0 : i32
    %159 = tpu.memref_slice %arg3[%c0_i32_124, %c0_i32_125] : memref<512x128xf32, #tpu.memory_space<any>> -> memref<1x128xf32, #tpu.memory_space<any>>
    %c15_i32_126 = arith.constant 15 : i32
    %c0_i32_127 = arith.constant 0 : i32
    %160 = tpu.memref_slice %arg4[%c15_i32_126, %c0_i32_127] : memref<16x128xf32, #tpu.memory_space<vmem>> -> memref<1x128xf32, #tpu.memory_space<vmem>>
    tpu.wait_dma2 semaphore(%arg5 : memref<!tpu.dma_semaphore, #tpu.memory_space<semaphore_mem>>) src(%159 : memref<1x128xf32, #tpu.memory_space<any>>) dst(%160 : memref<1x128xf32, #tpu.memory_space<vmem>>)
    %cst = arith.constant 0.000000e+00 : f32
    %161 = vector.broadcast %cst : f32 to vector<1x128xf32>
    %c0_i32_128 = arith.constant 0 : i32
    %162 = arith.cmpi eq, %83, %c0_i32_128 : i32
    %163 = arith.extui %162 : i1 to i32
    %c0_i32_129 = arith.constant 0 : i32
    %164 = arith.cmpi ne, %163, %c0_i32_129 : i32
    scf.if %164 {
      %c0 = arith.constant 0 : index
      %c0_160 = arith.constant 0 : index
      %210 = vector.load %arg4[%c0, %c0_160] : memref<16x128xf32, #tpu.memory_space<vmem>>, vector<1x128xf32>
      tpu.vector_store %arg4[%c0, %c0_160], %161 {strides = array<i32>} : memref<16x128xf32, #tpu.memory_space<vmem>>, vector<1x128xf32>,
    } else {
    }
    %c0_i32_130 = arith.constant 0 : i32
    %165 = arith.cmpi eq, %86, %c0_i32_130 : i32
    %166 = arith.extui %165 : i1 to i32
    %c0_i32_131 = arith.constant 0 : i32
    %167 = arith.cmpi ne, %166, %c0_i32_131 : i32
    scf.if %167 {
      %c1 = arith.constant 1 : index
      %c0 = arith.constant 0 : index
      %210 = vector.load %arg4[%c1, %c0] : memref<16x128xf32, #tpu.memory_space<vmem>>, vector<1x128xf32>
      tpu.vector_store %arg4[%c1, %c0], %161 {strides = array<i32>} : memref<16x128xf32, #tpu.memory_space<vmem>>, vector<1x128xf32>,
    } else {
    }
    %c0_i32_132 = arith.constant 0 : i32
    %168 = arith.cmpi eq, %89, %c0_i32_132 : i32
    %169 = arith.extui %168 : i1 to i32
    %c0_i32_133 = arith.constant 0 : i32
    %170 = arith.cmpi ne, %169, %c0_i32_133 : i32
    scf.if %170 {
      %c2 = arith.constant 2 : index
      %c0 = arith.constant 0 : index
      %210 = vector.load %arg4[%c2, %c0] : memref<16x128xf32, #tpu.memory_space<vmem>>, vector<1x128xf32>
      tpu.vector_store %arg4[%c2, %c0], %161 {strides = array<i32>} : memref<16x128xf32, #tpu.memory_space<vmem>>, vector<1x128xf32>,
    } else {
    }
    %c0_i32_134 = arith.constant 0 : i32
    %171 = arith.cmpi eq, %92, %c0_i32_134 : i32
    %172 = arith.extui %171 : i1 to i32
    %c0_i32_135 = arith.constant 0 : i32
    %173 = arith.cmpi ne, %172, %c0_i32_135 : i32
    scf.if %173 {
      %c3 = arith.constant 3 : index
      %c0 = arith.constant 0 : index
      %210 = vector.load %arg4[%c3, %c0] : memref<16x128xf32, #tpu.memory_space<vmem>>, vector<1x128xf32>
      tpu.vector_store %arg4[%c3, %c0], %161 {strides = array<i32>} : memref<16x128xf32, #tpu.memory_space<vmem>>, vector<1x128xf32>,
    } else {
    }
    %c0_i32_136 = arith.constant 0 : i32
    %174 = arith.cmpi eq, %95, %c0_i32_136 : i32
    %175 = arith.extui %174 : i1 to i32
    %c0_i32_137 = arith.constant 0 : i32
    %176 = arith.cmpi ne, %175, %c0_i32_137 : i32
    scf.if %176 {
      %c4 = arith.constant 4 : index
      %c0 = arith.constant 0 : index
      %210 = vector.load %arg4[%c4, %c0] : memref<16x128xf32, #tpu.memory_space<vmem>>, vector<1x128xf32>
      tpu.vector_store %arg4[%c4, %c0], %161 {strides = array<i32>} : memref<16x128xf32, #tpu.memory_space<vmem>>, vector<1x128xf32>,
    } else {
    }
    %c0_i32_138 = arith.constant 0 : i32
    %177 = arith.cmpi eq, %98, %c0_i32_138 : i32
    %178 = arith.extui %177 : i1 to i32
    %c0_i32_139 = arith.constant 0 : i32
    %179 = arith.cmpi ne, %178, %c0_i32_139 : i32
    scf.if %179 {
      %c5 = arith.constant 5 : index
      %c0 = arith.constant 0 : index
      %210 = vector.load %arg4[%c5, %c0] : memref<16x128xf32, #tpu.memory_space<vmem>>, vector<1x128xf32>
      tpu.vector_store %arg4[%c5, %c0], %161 {strides = array<i32>} : memref<16x128xf32, #tpu.memory_space<vmem>>, vector<1x128xf32>,
    } else {
    }
    %c0_i32_140 = arith.constant 0 : i32
    %180 = arith.cmpi eq, %101, %c0_i32_140 : i32
    %181 = arith.extui %180 : i1 to i32
    %c0_i32_141 = arith.constant 0 : i32
    %182 = arith.cmpi ne, %181, %c0_i32_141 : i32
    scf.if %182 {
      %c6 = arith.constant 6 : index
      %c0 = arith.constant 0 : index
      %210 = vector.load %arg4[%c6, %c0] : memref<16x128xf32, #tpu.memory_space<vmem>>, vector<1x128xf32>
      tpu.vector_store %arg4[%c6, %c0], %161 {strides = array<i32>} : memref<16x128xf32, #tpu.memory_space<vmem>>, vector<1x128xf32>,
    } else {
    }
    %c0_i32_142 = arith.constant 0 : i32
    %183 = arith.cmpi eq, %104, %c0_i32_142 : i32
    %184 = arith.extui %183 : i1 to i32
    %c0_i32_143 = arith.constant 0 : i32
    %185 = arith.cmpi ne, %184, %c0_i32_143 : i32
    scf.if %185 {
      %c7 = arith.constant 7 : index
      %c0 = arith.constant 0 : index
      %210 = vector.load %arg4[%c7, %c0] : memref<16x128xf32, #tpu.memory_space<vmem>>, vector<1x128xf32>
      tpu.vector_store %arg4[%c7, %c0], %161 {strides = array<i32>} : memref<16x128xf32, #tpu.memory_space<vmem>>, vector<1x128xf32>,
    } else {
    }
    %c0_i32_144 = arith.constant 0 : i32
    %186 = arith.cmpi eq, %107, %c0_i32_144 : i32
    %187 = arith.extui %186 : i1 to i32
    %c0_i32_145 = arith.constant 0 : i32
    %188 = arith.cmpi ne, %187, %c0_i32_145 : i32
    scf.if %188 {
      %c8 = arith.constant 8 : index
      %c0 = arith.constant 0 : index
      %210 = vector.load %arg4[%c8, %c0] : memref<16x128xf32, #tpu.memory_space<vmem>>, vector<1x128xf32>
      tpu.vector_store %arg4[%c8, %c0], %161 {strides = array<i32>} : memref<16x128xf32, #tpu.memory_space<vmem>>, vector<1x128xf32>,
    } else {
    }
    %c0_i32_146 = arith.constant 0 : i32
    %189 = arith.cmpi eq, %110, %c0_i32_146 : i32
    %190 = arith.extui %189 : i1 to i32
    %c0_i32_147 = arith.constant 0 : i32
    %191 = arith.cmpi ne, %190, %c0_i32_147 : i32
    scf.if %191 {
      %c9 = arith.constant 9 : index
      %c0 = arith.constant 0 : index
      %210 = vector.load %arg4[%c9, %c0] : memref<16x128xf32, #tpu.memory_space<vmem>>, vector<1x128xf32>
      tpu.vector_store %arg4[%c9, %c0], %161 {strides = array<i32>} : memref<16x128xf32, #tpu.memory_space<vmem>>, vector<1x128xf32>,
    } else {
    }
    %c0_i32_148 = arith.constant 0 : i32
    %192 = arith.cmpi eq, %113, %c0_i32_148 : i32
    %193 = arith.extui %192 : i1 to i32
    %c0_i32_149 = arith.constant 0 : i32
    %194 = arith.cmpi ne, %193, %c0_i32_149 : i32
    scf.if %194 {
      %c10 = arith.constant 10 : index
      %c0 = arith.constant 0 : index
      %210 = vector.load %arg4[%c10, %c0] : memref<16x128xf32, #tpu.memory_space<vmem>>, vector<1x128xf32>
      tpu.vector_store %arg4[%c10, %c0], %161 {strides = array<i32>} : memref<16x128xf32, #tpu.memory_space<vmem>>, vector<1x128xf32>,
    } else {
    }
    %c0_i32_150 = arith.constant 0 : i32
    %195 = arith.cmpi eq, %116, %c0_i32_150 : i32
    %196 = arith.extui %195 : i1 to i32
    %c0_i32_151 = arith.constant 0 : i32
    %197 = arith.cmpi ne, %196, %c0_i32_151 : i32
    scf.if %197 {
      %c11 = arith.constant 11 : index
      %c0 = arith.constant 0 : index
      %210 = vector.load %arg4[%c11, %c0] : memref<16x128xf32, #tpu.memory_space<vmem>>, vector<1x128xf32>
      tpu.vector_store %arg4[%c11, %c0], %161 {strides = array<i32>} : memref<16x128xf32, #tpu.memory_space<vmem>>, vector<1x128xf32>,
    } else {
    }
    %c0_i32_152 = arith.constant 0 : i32
    %198 = arith.cmpi eq, %119, %c0_i32_152 : i32
    %199 = arith.extui %198 : i1 to i32
    %c0_i32_153 = arith.constant 0 : i32
    %200 = arith.cmpi ne, %199, %c0_i32_153 : i32
    scf.if %200 {
      %c12 = arith.constant 12 : index
      %c0 = arith.constant 0 : index
      %210 = vector.load %arg4[%c12, %c0] : memref<16x128xf32, #tpu.memory_space<vmem>>, vector<1x128xf32>
      tpu.vector_store %arg4[%c12, %c0], %161 {strides = array<i32>} : memref<16x128xf32, #tpu.memory_space<vmem>>, vector<1x128xf32>,
    } else {
    }
    %c0_i32_154 = arith.constant 0 : i32
    %201 = arith.cmpi eq, %122, %c0_i32_154 : i32
    %202 = arith.extui %201 : i1 to i32
    %c0_i32_155 = arith.constant 0 : i32
    %203 = arith.cmpi ne, %202, %c0_i32_155 : i32
    scf.if %203 {
      %c13 = arith.constant 13 : index
      %c0 = arith.constant 0 : index
      %210 = vector.load %arg4[%c13, %c0] : memref<16x128xf32, #tpu.memory_space<vmem>>, vector<1x128xf32>
      tpu.vector_store %arg4[%c13, %c0], %161 {strides = array<i32>} : memref<16x128xf32, #tpu.memory_space<vmem>>, vector<1x128xf32>,
    } else {
    }
    %c0_i32_156 = arith.constant 0 : i32
    %204 = arith.cmpi eq, %125, %c0_i32_156 : i32
    %205 = arith.extui %204 : i1 to i32
    %c0_i32_157 = arith.constant 0 : i32
    %206 = arith.cmpi ne, %205, %c0_i32_157 : i32
    scf.if %206 {
      %c14 = arith.constant 14 : index
      %c0 = arith.constant 0 : index
      %210 = vector.load %arg4[%c14, %c0] : memref<16x128xf32, #tpu.memory_space<vmem>>, vector<1x128xf32>
      tpu.vector_store %arg4[%c14, %c0], %161 {strides = array<i32>} : memref<16x128xf32, #tpu.memory_space<vmem>>, vector<1x128xf32>,
    } else {
    }
    %c0_i32_158 = arith.constant 0 : i32
    %207 = arith.cmpi eq, %128, %c0_i32_158 : i32
    %208 = arith.extui %207 : i1 to i32
    %c0_i32_159 = arith.constant 0 : i32
    %209 = arith.cmpi ne, %208, %c0_i32_159 : i32
    scf.if %209 {
      %c15 = arith.constant 15 : index
      %c0 = arith.constant 0 : index
      %210 = vector.load %arg4[%c15, %c0] : memref<16x128xf32, #tpu.memory_space<vmem>>, vector<1x128xf32>
      tpu.vector_store %arg4[%c15, %c0], %161 {strides = array<i32>} : memref<16x128xf32, #tpu.memory_space<vmem>>, vector<1x128xf32>,
    } else {
    }
    return
  }
  func.func @transform_1(%arg0: i32, %arg1: memref<16xi32, #tpu.memory_space<smem>>, %arg2: memref<16xi32, #tpu.memory_space<smem>>) -> (i32, i32) {
    %c0_i32 = arith.constant 0 : i32
    %c0_i32_0 = arith.constant 0 : i32
    return %arg0, %c0_i32 : i32, i32
  }
}

</mosaic_0001>

<bundles_post_ra>
// kernel: tpu_custom_call.1
= control target key start
LH: loop header
LB: loop body
LE: loop exit
PB: predicated region body
PF: predicated region fallthrough
CT: control target
= control target key end

     0   :  { %s1390_s0 = inlined_call_operand.hbm [shape: s32[16], index: 0, kind: input, shape index: {}]   ;;  %s1391_s2 = inlined_call_operand.hbm [shape: f32[512,128], index: 2, kind: input, shape index: {}]   ;;  %s1392_s3 = inlined_call_operand.hbm [shape: f32[16,128], index: 3, kind: output, shape index: {}]   ;;  %s1393_s1 = inlined_call_operand.vmem [shape: s32[16], index: 1, kind: input, shape index: {}]  }
   0x1   :  { %s554_s14 = scalar_lea.hbm %s1390_s0, 16 }
   0x2   :  { %p555_p0 = scmp.ne.s32.totalorder %s1390_s0, %s554_s14  ;;  %p558_p1 = scmp.lt.u32.totalorder %s554_s14, %s1390_s0 }
   0x4   :  { %p560_p2 = pnand %p558_p1, %p555_p0 }
   0x6   :  { %563 = shalt.err (!%p560_p2)  }
   0x7   :  { %s988_s19 = smov [#allocation4]   ;;  %s10_s24 = sshll.u32 %s1393_s1, 4  ;;  %s11_s24 = int_to_ptr.vmem [resolvable:$true] %s10_s24 }
   0x8   :  { %9 = dma.hbm_to_smem %s1390_s0, 16, %s988_s19, [#allocation3] }
   0x9   :  { %s564_s25 = scalar_lea.vmem %s11_s24, 16  ;;  %p569_p4 = scmp.lt.s32.totalorder %s11_s24, %s11_s24 }
   0xa   :  { %p565_p3 = scmp.ne.s32.totalorder %s11_s24, %s564_s25  ;;  %p570_p5 = scmp.lt.s32.totalorder %s564_s25, %s564_s25 }
   0xc   :  { %p571_p6 = por %p570_p5, %p569_p4 }
   0xe   :  { %p572_p7 = pnand %p571_p6, %p565_p3 }
  0x10   :  { %575 = shalt.err (!%p572_p7)  }
  0x11   :  { %s989_s26 = smov [#allocation5]  }
  0x12   :  { %13 = dma.vmem_to_smem %s11_s24, 16, %s989_s26, [#allocation3] }
  0x13   :  { %982 = dma.done.wait [#allocation3], 32 }
  0x14   :  { %983 = vsyncadd [#allocation3], 4294967264 }
  0x15   :  { %15 = sfence }
  0x16   :  { %16 = vsyncpa [#allocation7], 0  ;;  %s18_s27 = sld [smem:[#allocation4]]  ;;  %s990_s0 = smov [#allocation6]  }
  0x17   :  { %s28_s28 = sshll.u32 %s990_s0, 4  ;;  %s1059_s29 = sld [smem:[#allocation4 + $0x1]]  ;;  %s1061_s28 = int_to_ptr.vmem [resolvable:$true] %s28_s28 }
  0x18   :  { %s991_s1 = smov [#allocation6 + $0x1]   ;;  %s1063_s4 = sld [smem:[#allocation4 + $0x2]] }
  0x19   :  { %s44_s30 = sshll.u32 %s991_s1, 4  ;;  %s992_s5 = smov [#allocation6 + $0x2]   ;;  %s1065_s30 = int_to_ptr.vmem [resolvable:$true] %s44_s30 }
  0x1a   :  { %s60_s6 = sshll.u32 %s992_s5, 4  ;;  %s1067_s7 = sld [smem:[#allocation4 + $0x3]]  ;;  %s1069_s6 = int_to_ptr.vmem [resolvable:$true] %s60_s6 }
  0x1b   :  { %s1078_s16 = scalar_lea.hbm %s1391_s2, 8192 }
  0x1c   :  { %s455_s8 = sshll.u32 %s18_s27, 4 }
  0x1d   :  { %s20_s11 = scalar_lea.hbm %s1391_s2, %s455_s8  ;;  %s457_s12 = sshll.u32 %s1059_s29, 4 }
  0x1e   :  { %s576_s13 = scalar_lea.hbm %s20_s11, 16  ;;  %p579_p9 = scmp.lt.u32.totalorder %s20_s11, %s1391_s2 }
  0x1f   :  { %p577_p8 = scmp.ne.s32.totalorder %s20_s11, %s576_s13  ;;  %p580_p10 = scmp.lt.u32.totalorder %s1078_s16, %s576_s13 }
  0x20   :  { %p582_p12 = scmp.lt.u32.totalorder %s576_s13, %s20_s11 }
  0x21   :  { %p581_p11 = por %p580_p10, %p579_p9 }
  0x23   :  { %p583_p13 = por %p582_p12, %p581_p11 }
  0x25   :  { %p584_p0 = pnand %p583_p13, %p577_p8 }
  0x27   :  { %587 = shalt.err (!%p584_p0)  }
  0x28   :  { %s588_s19 = scalar_lea.vmem %s1061_s28, 16  ;;  %s1087_s20 = scalar_lea.vmem %s1061_s28, 256 }
  0x29   :  { %p589_p1 = scmp.ne.s32.totalorder %s1061_s28, %s588_s19  ;;  %p593_p2 = scmp.lt.s32.totalorder %s1061_s28, %s1061_s28 }
  0x2a   :  { %p594_p3 = scmp.lt.s32.totalorder %s1087_s20, %s588_s19 }
  0x2c   :  { %p595_p4 = por %p594_p3, %p593_p2 }
  0x2e   :  { %p596_p5 = pnand %p595_p4, %p589_p1 }
  0x30   :  { %599 = shalt.err (!%p596_p5)  }
  0x31   :  { %31 = dma.hbm_to_vmem [thread:$0]  %s20_s11, 16, %s1061_s28, [#allocation2] }
  0x32   :  { %s35_s23 = scalar_lea.hbm %s1391_s2, %s457_s12  ;;  %s459_s24 = sshll.u32 %s1063_s4, 4 }
  0x33   :  { %s600_s25 = scalar_lea.hbm %s35_s23, 16  ;;  %p603_p7 = scmp.lt.u32.totalorder %s35_s23, %s1391_s2 }
  0x34   :  { %p601_p6 = scmp.ne.s32.totalorder %s35_s23, %s600_s25  ;;  %p604_p8 = scmp.lt.u32.totalorder %s1078_s16, %s600_s25 }
  0x35   :  { %p606_p10 = scmp.lt.u32.totalorder %s600_s25, %s35_s23 }
  0x36   :  { %p605_p9 = por %p604_p8, %p603_p7 }
  0x38   :  { %p607_p11 = por %p606_p10, %p605_p9 }
  0x3a   :  { %p608_p12 = pnand %p607_p11, %p601_p6 }
  0x3c   :  { %611 = shalt.err (!%p608_p12)  }
  0x3d   :  { %s612_s0 = scalar_lea.vmem %s1065_s30, 16  ;;  %p617_p0 = scmp.lt.s32.totalorder %s1065_s30, %s1061_s28 }
  0x3e   :  { %p613_p13 = scmp.ne.s32.totalorder %s1065_s30, %s612_s0  ;;  %p618_p1 = scmp.lt.s32.totalorder %s1087_s20, %s612_s0 }
  0x40   :  { %p619_p3 = por %p618_p1, %p617_p0 }
  0x42   :  { %p620_p4 = pnand %p619_p3, %p613_p13 }
  0x44   :  { %623 = shalt.err (!%p620_p4)  }
  0x45   :  { %47 = dma.hbm_to_vmem [thread:$0]  %s35_s23, 16, %s1065_s30, [#allocation2] }
  0x46   :  { %s51_s4 = scalar_lea.hbm %s1391_s2, %s459_s24  ;;  %s461_s5 = sshll.u32 %s1067_s7, 4 }
  0x47   :  { %s624_s8 = scalar_lea.hbm %s51_s4, 16  ;;  %p627_p6 = scmp.lt.u32.totalorder %s51_s4, %s1391_s2 }
  0x48   :  { %p625_p5 = scmp.ne.s32.totalorder %s51_s4, %s624_s8  ;;  %p628_p7 = scmp.lt.u32.totalorder %s1078_s16, %s624_s8 }
  0x49   :  { %p630_p9 = scmp.lt.u32.totalorder %s624_s8, %s51_s4 }
  0x4a   :  { %p629_p8 = por %p628_p7, %p627_p6 }
  0x4c   :  { %p631_p10 = por %p630_p9, %p629_p8 }
  0x4e   :  { %p632_p11 = pnand %p631_p10, %p625_p5 }
  0x50   :  { %635 = shalt.err (!%p632_p11)  }
  0x51   :  { %s636_s30 = scalar_lea.vmem %s1069_s6, 16  ;;  %p641_p13 = scmp.lt.s32.totalorder %s1069_s6, %s1061_s28 }
  0x52   :  { %p637_p12 = scmp.ne.s32.totalorder %s1069_s6, %s636_s30  ;;  %p642_p0 = scmp.lt.s32.totalorder %s1087_s20, %s636_s30 }
  0x54   :  { %p643_p1 = por %p642_p0, %p641_p13 }
  0x56   :  { %p644_p3 = pnand %p643_p1, %p637_p12 }
  0x58   :  { %647 = shalt.err (!%p644_p3)  }
  0x59   :  { %63 = dma.hbm_to_vmem [thread:$0]  %s51_s4, 16, %s1069_s6, [#allocation2] }
  0x5a   :  { %s67_s12 = scalar_lea.hbm %s1391_s2, %s461_s5  ;;  %s993_s13 = smov [#allocation6 + $0x3]  }
  0x5b   :  { %s76_s14 = sshll.u32 %s993_s13, 4  ;;  %s1127_s15 = sld [smem:[#allocation4 + $0x4]]  ;;  %s77_s14 = int_to_ptr.vmem [resolvable:$true] %s76_s14 }
  0x5c   :  { %s648_s17 = scalar_lea.hbm %s67_s12, 16  ;;  %p651_p5 = scmp.lt.u32.totalorder %s67_s12, %s1391_s2 }
  0x5d   :  { %p649_p4 = scmp.ne.s32.totalorder %s67_s12, %s648_s17  ;;  %p652_p6 = scmp.lt.u32.totalorder %s1078_s16, %s648_s17 }
  0x5e   :  { %p654_p8 = scmp.lt.u32.totalorder %s648_s17, %s67_s12 }
  0x5f   :  { %p653_p7 = por %p652_p6, %p651_p5 }
  0x61   :  { %p655_p9 = por %p654_p8, %p653_p7 }
  0x63   :  { %p656_p10 = pnand %p655_p9, %p649_p4 }
  0x65   :  { %659 = shalt.err (!%p656_p10)  }
  0x66   :  { %s660_s6 = scalar_lea.vmem %s77_s14, 16  ;;  %p665_p12 = scmp.lt.s32.totalorder %s77_s14, %s1061_s28 }
  0x67   :  { %p661_p11 = scmp.ne.s32.totalorder %s77_s14, %s660_s6  ;;  %p666_p13 = scmp.lt.s32.totalorder %s1087_s20, %s660_s6 }
  0x69   :  { %p667_p0 = por %p666_p13, %p665_p12 }
  0x6b   :  { %p668_p1 = pnand %p667_p0, %p661_p11 }
  0x6d   :  { %671 = shalt.err (!%p668_p1)  }
  0x6e   :  { %79 = dma.hbm_to_vmem [thread:$0]  %s67_s12, 16, %s77_s14, [#allocation2] }
  0x6f   :  { %s994_s21 = smov [#allocation6 + $0x4]   ;;  %s1135_s23 = sld [smem:[#allocation4 + $0x5]] }
  0x70   :  { %s92_s22 = sshll.u32 %s994_s21, 4  ;;  %s995_s24 = smov [#allocation6 + $0x5]   ;;  %s93_s22 = int_to_ptr.vmem [resolvable:$true] %s92_s22 }
  0x71   :  { %s108_s25 = sshll.u32 %s995_s24, 4  ;;  %s1137_s26 = sld [smem:[#allocation4 + $0x6]]  ;;  %s1140_s25 = int_to_ptr.vmem [resolvable:$true] %s108_s25 }
  0x72   :  { %s463_s27 = sshll.u32 %s1127_s15, 4 }
  0x73   :  { %s83_s1 = scalar_lea.hbm %s1391_s2, %s463_s27 }
  0x74   :  { %s672_s4 = scalar_lea.hbm %s83_s1, 16  ;;  %p675_p4 = scmp.lt.u32.totalorder %s83_s1, %s1391_s2 }
  0x75   :  { %p673_p3 = scmp.ne.s32.totalorder %s83_s1, %s672_s4  ;;  %p676_p5 = scmp.lt.u32.totalorder %s1078_s16, %s672_s4 }
  0x76   :  { %p678_p7 = scmp.lt.u32.totalorder %s672_s4, %s83_s1 }
  0x77   :  { %p677_p6 = por %p676_p5, %p675_p4 }
  0x79   :  { %p679_p8 = por %p678_p7, %p677_p6 }
  0x7b   :  { %p680_p9 = pnand %p679_p8, %p673_p3 }
  0x7d   :  { %683 = shalt.err (!%p680_p9)  }
  0x7e   :  { %s684_s9 = scalar_lea.vmem %s93_s22, 16  ;;  %p689_p11 = scmp.lt.s32.totalorder %s93_s22, %s1061_s28 }
  0x7f   :  { %p685_p10 = scmp.ne.s32.totalorder %s93_s22, %s684_s9  ;;  %p690_p12 = scmp.lt.s32.totalorder %s1087_s20, %s684_s9 }
  0x81   :  { %p691_p13 = por %p690_p12, %p689_p11 }
  0x83   :  { %p692_p0 = pnand %p691_p13, %p685_p10 }
  0x85   :  { %695 = shalt.err (!%p692_p0)  }
  0x86   :  { %95 = dma.hbm_to_vmem [thread:$0]  %s83_s1, 16, %s93_s22, [#allocation2] }
  0x87   :  { %s465_s10 = sshll.u32 %s1135_s23, 4  ;;  %s996_s30 = smov [#allocation6 + $0x6]  }
  0x88   :  { %s124_s7 = sshll.u32 %s996_s30, 4  ;;  %s99_s13 = scalar_lea.hbm %s1391_s2, %s465_s10  ;;  %s1155_s7 = int_to_ptr.vmem [resolvable:$true] %s124_s7 }
  0x89   :  { %s696_s14 = scalar_lea.hbm %s99_s13, 16  ;;  %p699_p3 = scmp.lt.u32.totalorder %s99_s13, %s1391_s2 }
  0x8a   :  { %p697_p1 = scmp.ne.s32.totalorder %s99_s13, %s696_s14  ;;  %p700_p4 = scmp.lt.u32.totalorder %s1078_s16, %s696_s14 }
  0x8b   :  { %p702_p6 = scmp.lt.u32.totalorder %s696_s14, %s99_s13 }
  0x8c   :  { %p701_p5 = por %p700_p4, %p699_p3 }
  0x8e   :  { %p703_p7 = por %p702_p6, %p701_p5 }
  0x90   :  { %p704_p8 = pnand %p703_p7, %p697_p1 }
  0x92   :  { %707 = shalt.err (!%p704_p8)  }
  0x93   :  { %s708_s18 = scalar_lea.vmem %s1140_s25, 16  ;;  %p713_p10 = scmp.lt.s32.totalorder %s1140_s25, %s1061_s28 }
  0x94   :  { %p709_p9 = scmp.ne.s32.totalorder %s1140_s25, %s708_s18  ;;  %p714_p11 = scmp.lt.s32.totalorder %s1087_s20, %s708_s18 }
  0x96   :  { %p715_p12 = por %p714_p11, %p713_p10 }
  0x98   :  { %p716_p13 = pnand %p715_p12, %p709_p9 }
  0x9a   :  { %719 = shalt.err (!%p716_p13)  }
  0x9b   :  { %111 = dma.hbm_to_vmem [thread:$0]  %s99_s13, 16, %s1140_s25, [#allocation2] }
  0x9c   :  { %s467_s19 = sshll.u32 %s1137_s26, 4  ;;  %s1168_s6 = sld [smem:[#allocation4 + $0x7]] }
  0x9d   :  { %s115_s23 = scalar_lea.hbm %s1391_s2, %s467_s19 }
  0x9e   :  { %s720_s24 = scalar_lea.hbm %s115_s23, 16  ;;  %p723_p1 = scmp.lt.u32.totalorder %s115_s23, %s1391_s2 }
  0x9f   :  { %p721_p0 = scmp.ne.s32.totalorder %s115_s23, %s720_s24  ;;  %p724_p3 = scmp.lt.u32.totalorder %s1078_s16, %s720_s24 }
  0xa0   :  { %p726_p5 = scmp.lt.u32.totalorder %s720_s24, %s115_s23 }
  0xa1   :  { %p725_p4 = por %p724_p3, %p723_p1 }
  0xa3   :  { %p727_p6 = por %p726_p5, %p725_p4 }
  0xa5   :  { %p728_p7 = pnand %p727_p6, %p721_p0 }
  0xa7   :  { %731 = shalt.err (!%p728_p7)  }
  0xa8   :  { %s732_s25 = scalar_lea.vmem %s1155_s7, 16  ;;  %p737_p9 = scmp.lt.s32.totalorder %s1155_s7, %s1061_s28 }
  0xa9   :  { %p733_p8 = scmp.ne.s32.totalorder %s1155_s7, %s732_s25  ;;  %p738_p10 = scmp.lt.s32.totalorder %s1087_s20, %s732_s25 }
  0xab   :  { %p739_p11 = por %p738_p10, %p737_p9 }
  0xad   :  { %p740_p12 = pnand %p739_p11, %p733_p8 }
  0xaf   :  { %743 = shalt.err (!%p740_p12)  }
  0xb0   :  { %127 = dma.hbm_to_vmem [thread:$0]  %s115_s23, 16, %s1155_s7, [#allocation2] }
  0xb1   :  { %s997_s26 = smov [#allocation6 + $0x7]   ;;  %s1183_s1 = sld [smem:[#allocation4 + $0x8]] }
  0xb2   :  { %s140_s29 = sshll.u32 %s997_s26, 4  ;;  %s998_s4 = smov [#allocation6 + $0x8]   ;;  %s141_s29 = int_to_ptr.vmem [resolvable:$true] %s140_s29 }
  0xb3   :  { %s156_s5 = sshll.u32 %s998_s4, 4  ;;  %s1185_s8 = sld [smem:[#allocation4 + $0x9]]  ;;  %s1188_s5 = int_to_ptr.vmem [resolvable:$true] %s156_s5 }
  0xb4   :  { %s469_s9 = sshll.u32 %s1168_s6, 4 }
  0xb5   :  { %s131_s11 = scalar_lea.hbm %s1391_s2, %s469_s9 }
  0xb6   :  { %s744_s12 = scalar_lea.hbm %s131_s11, 16  ;;  %p747_p0 = scmp.lt.u32.totalorder %s131_s11, %s1391_s2 }
  0xb7   :  { %p745_p13 = scmp.ne.s32.totalorder %s131_s11, %s744_s12  ;;  %p748_p1 = scmp.lt.u32.totalorder %s1078_s16, %s744_s12 }
  0xb8   :  { %p750_p4 = scmp.lt.u32.totalorder %s744_s12, %s131_s11 }
  0xb9   :  { %p749_p3 = por %p748_p1, %p747_p0 }
  0xbb   :  { %p751_p5 = por %p750_p4, %p749_p3 }
  0xbd   :  { %p752_p6 = pnand %p751_p5, %p745_p13 }
  0xbf   :  { %755 = shalt.err (!%p752_p6)  }
  0xc0   :  { %s756_s14 = scalar_lea.vmem %s141_s29, 16  ;;  %p761_p8 = scmp.lt.s32.totalorder %s141_s29, %s1061_s28 }
  0xc1   :  { %p757_p7 = scmp.ne.s32.totalorder %s141_s29, %s756_s14  ;;  %p762_p9 = scmp.lt.s32.totalorder %s1087_s20, %s756_s14 }
  0xc3   :  { %p763_p10 = por %p762_p9, %p761_p8 }
  0xc5   :  { %p764_p11 = pnand %p763_p10, %p757_p7 }
  0xc7   :  { %767 = shalt.err (!%p764_p11)  }
  0xc8   :  { %143 = dma.hbm_to_vmem [thread:$0]  %s131_s11, 16, %s141_s29, [#allocation2] }
  0xc9   :  { %s471_s15 = sshll.u32 %s1183_s1, 4  ;;  %s999_s17 = smov [#allocation6 + $0x9]  }
  0xca   :  { %s172_s18 = sshll.u32 %s999_s17, 4  ;;  %s147_s21 = scalar_lea.hbm %s1391_s2, %s471_s15  ;;  %s1203_s18 = int_to_ptr.vmem [resolvable:$true] %s172_s18 }
  0xcb   :  { %s768_s22 = scalar_lea.hbm %s147_s21, 16  ;;  %p771_p13 = scmp.lt.u32.totalorder %s147_s21, %s1391_s2 }
  0xcc   :  { %p769_p12 = scmp.ne.s32.totalorder %s147_s21, %s768_s22  ;;  %p772_p0 = scmp.lt.u32.totalorder %s1078_s16, %s768_s22 }
  0xcd   :  { %p774_p3 = scmp.lt.u32.totalorder %s768_s22, %s147_s21 }
  0xce   :  { %p773_p1 = por %p772_p0, %p771_p13 }
  0xd0   :  { %p775_p4 = por %p774_p3, %p773_p1 }
  0xd2   :  { %p776_p5 = pnand %p775_p4, %p769_p12 }
  0xd4   :  { %779 = shalt.err (!%p776_p5)  }
  0xd5   :  { %s780_s27 = scalar_lea.vmem %s1188_s5, 16  ;;  %p785_p7 = scmp.lt.s32.totalorder %s1188_s5, %s1061_s28 }
  0xd6   :  { %p781_p6 = scmp.ne.s32.totalorder %s1188_s5, %s780_s27  ;;  %p786_p8 = scmp.lt.s32.totalorder %s1087_s20, %s780_s27 }
  0xd8   :  { %p787_p9 = por %p786_p8, %p785_p7 }
  0xda   :  { %p788_p10 = pnand %p787_p9, %p781_p6 }
  0xdc   :  { %791 = shalt.err (!%p788_p10)  }
  0xdd   :  { %159 = dma.hbm_to_vmem [thread:$0]  %s147_s21, 16, %s1188_s5, [#allocation2] }
  0xde   :  { %s473_s0 = sshll.u32 %s1185_s8, 4  ;;  %s1216_s25 = sld [smem:[#allocation4 + $0xa]] }
  0xdf   :  { %s163_s1 = scalar_lea.hbm %s1391_s2, %s473_s0 }
  0xe0   :  { %s792_s4 = scalar_lea.hbm %s163_s1, 16  ;;  %p795_p12 = scmp.lt.u32.totalorder %s163_s1, %s1391_s2 }
  0xe1   :  { %p793_p11 = scmp.ne.s32.totalorder %s163_s1, %s792_s4  ;;  %p796_p13 = scmp.lt.u32.totalorder %s1078_s16, %s792_s4 }
  0xe2   :  { %p798_p1 = scmp.lt.u32.totalorder %s792_s4, %s163_s1 }
  0xe3   :  { %p797_p0 = por %p796_p13, %p795_p12 }
  0xe5   :  { %p799_p3 = por %p798_p1, %p797_p0 }
  0xe7   :  { %p800_p4 = pnand %p799_p3, %p793_p11 }
  0xe9   :  { %803 = shalt.err (!%p800_p4)  }
  0xea   :  { %s804_s5 = scalar_lea.vmem %s1203_s18, 16  ;;  %p809_p6 = scmp.lt.s32.totalorder %s1203_s18, %s1061_s28 }
  0xeb   :  { %p805_p5 = scmp.ne.s32.totalorder %s1203_s18, %s804_s5  ;;  %p810_p7 = scmp.lt.s32.totalorder %s1087_s20, %s804_s5 }
  0xed   :  { %p811_p8 = por %p810_p7, %p809_p6 }
  0xef   :  { %p812_p9 = pnand %p811_p8, %p805_p5 }
  0xf1   :  { %815 = shalt.err (!%p812_p9)  }
  0xf2   :  { %175 = dma.hbm_to_vmem [thread:$0]  %s163_s1, 16, %s1203_s18, [#allocation2] }
  0xf3   :  { %s1000_s8 = smov [#allocation6 + $0xa]   ;;  %s1231_s11 = sld [smem:[#allocation4 + $0xb]] }
  0xf4   :  { %s188_s30 = sshll.u32 %s1000_s8, 4  ;;  %s1001_s12 = smov [#allocation6 + $0xb]   ;;  %s189_s30 = int_to_ptr.vmem [resolvable:$true] %s188_s30 }
  0xf5   :  { %s204_s13 = sshll.u32 %s1001_s12, 4  ;;  %s1233_s7 = sld [smem:[#allocation4 + $0xc]]  ;;  %s1236_s13 = int_to_ptr.vmem [resolvable:$true] %s204_s13 }
  0xf6   :  { %s475_s14 = sshll.u32 %s1216_s25, 4 }
  0xf7   :  { %s179_s19 = scalar_lea.hbm %s1391_s2, %s475_s14 }
  0xf8   :  { %s816_s6 = scalar_lea.hbm %s179_s19, 16  ;;  %p819_p11 = scmp.lt.u32.totalorder %s179_s19, %s1391_s2 }
  0xf9   :  { %p817_p10 = scmp.ne.s32.totalorder %s179_s19, %s816_s6  ;;  %p820_p12 = scmp.lt.u32.totalorder %s1078_s16, %s816_s6 }
  0xfa   :  { %p822_p0 = scmp.lt.u32.totalorder %s816_s6, %s179_s19 }
  0xfb   :  { %p821_p13 = por %p820_p12, %p819_p11 }
  0xfd   :  { %p823_p1 = por %p822_p0, %p821_p13 }
  0xff   :  { %p824_p3 = pnand %p823_p1, %p817_p10 }
 0x101   :  { %827 = shalt.err (!%p824_p3)  }
 0x102   :  { %s828_s22 = scalar_lea.vmem %s189_s30, 16  ;;  %p833_p5 = scmp.lt.s32.totalorder %s189_s30, %s1061_s28 }
 0x103   :  { %p829_p4 = scmp.ne.s32.totalorder %s189_s30, %s828_s22  ;;  %p834_p6 = scmp.lt.s32.totalorder %s1087_s20, %s828_s22 }
 0x105   :  { %p835_p7 = por %p834_p6, %p833_p5 }
 0x107   :  { %p836_p8 = pnand %p835_p7, %p829_p4 }
 0x109   :  { %839 = shalt.err (!%p836_p8)  }
 0x10a   :  { %191 = dma.hbm_to_vmem [thread:$0]  %s179_s19, 16, %s189_s30, [#allocation2] }
 0x10b   :  { %s477_s23 = sshll.u32 %s1231_s11, 4  ;;  %s1002_s24 = smov [#allocation6 + $0xc]  }
 0x10c   :  { %s220_s27 = sshll.u32 %s1002_s24, 4  ;;  %s195_s26 = scalar_lea.hbm %s1391_s2, %s477_s23  ;;  %s1251_s27 = int_to_ptr.vmem [resolvable:$true] %s220_s27 }
 0x10d   :  { %s840_s29 = scalar_lea.hbm %s195_s26, 16  ;;  %p843_p10 = scmp.lt.u32.totalorder %s195_s26, %s1391_s2 }
 0x10e   :  { %p841_p9 = scmp.ne.s32.totalorder %s195_s26, %s840_s29  ;;  %p844_p11 = scmp.lt.u32.totalorder %s1078_s16, %s840_s29 }
 0x10f   :  { %p846_p13 = scmp.lt.u32.totalorder %s840_s29, %s195_s26 }
 0x110   :  { %p845_p12 = por %p844_p11, %p843_p10 }
 0x112   :  { %p847_p0 = por %p846_p13, %p845_p12 }
 0x114   :  { %p848_p1 = pnand %p847_p0, %p841_p9 }
 0x116   :  { %851 = shalt.err (!%p848_p1)  }
 0x117   :  { %s852_s9 = scalar_lea.vmem %s1236_s13, 16  ;;  %p857_p4 = scmp.lt.s32.totalorder %s1236_s13, %s1061_s28 }
 0x118   :  { %p853_p3 = scmp.ne.s32.totalorder %s1236_s13, %s852_s9  ;;  %p858_p5 = scmp.lt.s32.totalorder %s1087_s20, %s852_s9 }
 0x11a   :  { %p859_p6 = por %p858_p5, %p857_p4 }
 0x11c   :  { %p860_p7 = pnand %p859_p6, %p853_p3 }
 0x11e   :  { %863 = shalt.err (!%p860_p7)  }
 0x11f   :  { %207 = dma.hbm_to_vmem [thread:$0]  %s195_s26, 16, %s1236_s13, [#allocation2] }
 0x120   :  { %s479_s10 = sshll.u32 %s1233_s7, 4  ;;  %s1264_s5 = sld [smem:[#allocation4 + $0xd]] }
 0x121   :  { %s211_s11 = scalar_lea.hbm %s1391_s2, %s479_s10 }
 0x122   :  { %s864_s12 = scalar_lea.hbm %s211_s11, 16  ;;  %p867_p9 = scmp.lt.u32.totalorder %s211_s11, %s1391_s2 }
 0x123   :  { %p865_p8 = scmp.ne.s32.totalorder %s211_s11, %s864_s12  ;;  %p868_p10 = scmp.lt.u32.totalorder %s1078_s16, %s864_s12 }
 0x124   :  { %p870_p12 = scmp.lt.u32.totalorder %s864_s12, %s211_s11 }
 0x125   :  { %p869_p11 = por %p868_p10, %p867_p9 }
 0x127   :  { %p871_p13 = por %p870_p12, %p869_p11 }
 0x129   :  { %p872_p0 = pnand %p871_p13, %p865_p8 }
 0x12b   :  { %875 = shalt.err (!%p872_p0)  }
 0x12c   :  { %s876_s13 = scalar_lea.vmem %s1251_s27, 16  ;;  %p881_p3 = scmp.lt.s32.totalorder %s1251_s27, %s1061_s28 }
 0x12d   :  { %p877_p1 = scmp.ne.s32.totalorder %s1251_s27, %s876_s13  ;;  %p882_p4 = scmp.lt.s32.totalorder %s1087_s20, %s876_s13 }
 0x12f   :  { %p883_p5 = por %p882_p4, %p881_p3 }
 0x131   :  { %p884_p6 = pnand %p883_p5, %p877_p1 }
 0x133   :  { %887 = shalt.err (!%p884_p6)  }
 0x134   :  { %223 = dma.hbm_to_vmem [thread:$0]  %s211_s11, 16, %s1251_s27, [#allocation2] }
 0x135   :  { %s1003_s7 = smov [#allocation6 + $0xd]   ;;  %s1279_s19 = sld [smem:[#allocation4 + $0xe]] }
 0x136   :  { %s236_s17 = sshll.u32 %s1003_s7, 4  ;;  %s1004_s6 = smov [#allocation6 + $0xe]   ;;  %s237_s17 = int_to_ptr.vmem [resolvable:$true] %s236_s17 }
 0x137   :  { %s252_s21 = sshll.u32 %s1004_s6, 4  ;;  %s1281_s18 = sld [smem:[#allocation4 + $0xf]]  ;;  %s1284_s21 = int_to_ptr.vmem [resolvable:$true] %s252_s21 }
 0x138   :  { %s481_s22 = sshll.u32 %s1264_s5, 4 }
 0x139   :  { %s227_s0 = scalar_lea.hbm %s1391_s2, %s481_s22 }
 0x13a   :  { %s888_s25 = scalar_lea.hbm %s227_s0, 16  ;;  %p891_p8 = scmp.lt.u32.totalorder %s227_s0, %s1391_s2 }
 0x13b   :  { %p889_p7 = scmp.ne.s32.totalorder %s227_s0, %s888_s25  ;;  %p892_p9 = scmp.lt.u32.totalorder %s1078_s16, %s888_s25 }
 0x13c   :  { %p894_p11 = scmp.lt.u32.totalorder %s888_s25, %s227_s0 }
 0x13d   :  { %p893_p10 = por %p892_p9, %p891_p8 }
 0x13f   :  { %p895_p12 = por %p894_p11, %p893_p10 }
 0x141   :  { %p896_p13 = pnand %p895_p12, %p889_p7 }
 0x143   :  { %899 = shalt.err (!%p896_p13)  }
 0x144   :  { %s900_s29 = scalar_lea.vmem %s237_s17, 16  ;;  %p905_p1 = scmp.lt.s32.totalorder %s237_s17, %s1061_s28 }
 0x145   :  { %p901_p0 = scmp.ne.s32.totalorder %s237_s17, %s900_s29  ;;  %p906_p3 = scmp.lt.s32.totalorder %s1087_s20, %s900_s29 }
 0x147   :  { %p907_p4 = por %p906_p3, %p905_p1 }
 0x149   :  { %p908_p5 = pnand %p907_p4, %p901_p0 }
 0x14b   :  { %911 = shalt.err (!%p908_p5)  }
 0x14c   :  { %239 = dma.hbm_to_vmem [thread:$0]  %s227_s0, 16, %s237_s17, [#allocation2] }
 0x14d   :  { %s483_s1 = sshll.u32 %s1279_s19, 4  ;;  %s1005_s4 = smov [#allocation6 + $0xf]  }
 0x14e   :  { %s268_s9 = sshll.u32 %s1005_s4, 4  ;;  %s243_s8 = scalar_lea.hbm %s1391_s2, %s483_s1  ;;  %s1299_s9 = int_to_ptr.vmem [resolvable:$true] %s268_s9 }
 0x14f   :  { %s912_s30 = scalar_lea.hbm %s243_s8, 16  ;;  %p915_p7 = scmp.lt.u32.totalorder %s243_s8, %s1391_s2 }
 0x150   :  { %p913_p6 = scmp.ne.s32.totalorder %s243_s8, %s912_s30  ;;  %p916_p8 = scmp.lt.u32.totalorder %s1078_s16, %s912_s30 }
 0x151   :  { %p918_p10 = scmp.lt.u32.totalorder %s912_s30, %s243_s8 }
 0x152   :  { %p917_p9 = por %p916_p8, %p915_p7 }
 0x154   :  { %p919_p11 = por %p918_p10, %p917_p9 }
 0x156   :  { %p920_p12 = pnand %p919_p11, %p913_p6 }
 0x158   :  { %923 = shalt.err (!%p920_p12)  }
 0x159   :  { %s924_s14 = scalar_lea.vmem %s1284_s21, 16  ;;  %p929_p0 = scmp.lt.s32.totalorder %s1284_s21, %s1061_s28 }
 0x15a   :  { %p925_p13 = scmp.ne.s32.totalorder %s1284_s21, %s924_s14  ;;  %p930_p1 = scmp.lt.s32.totalorder %s1087_s20, %s924_s14 }
 0x15c   :  { %p931_p3 = por %p930_p1, %p929_p0 }
 0x15e   :  { %p932_p4 = pnand %p931_p3, %p925_p13 }
 0x160   :  { %935 = shalt.err (!%p932_p4)  }
 0x161   :  { %255 = dma.hbm_to_vmem [thread:$0]  %s243_s8, 16, %s1284_s21, [#allocation2] }
 0x162   :  { %s485_s15 = sshll.u32 %s1281_s18, 4  ;;  %s1312_s13 = sld [smem:[#allocation5]] }
 0x163   :  { %s259_s19 = scalar_lea.hbm %s1391_s2, %s485_s15  ;;  %s1317_s6 = sld [smem:[#allocation5 + $0x1]] }
 0x164   :  { %s936_s22 = scalar_lea.hbm %s259_s19, 16  ;;  %p939_p6 = scmp.lt.u32.totalorder %s259_s19, %s1391_s2 }
 0x165   :  { %p937_p5 = scmp.ne.s32.totalorder %s259_s19, %s936_s22  ;;  %p940_p7 = scmp.lt.u32.totalorder %s1078_s16, %s936_s22 }
 0x166   :  { %p942_p9 = scmp.lt.u32.totalorder %s936_s22, %s259_s19 }
 0x167   :  { %p941_p8 = por %p940_p7, %p939_p6 }
 0x169   :  { %p943_p10 = por %p942_p9, %p941_p8 }
 0x16b   :  { %p944_p11 = pnand %p943_p10, %p937_p5 }
 0x16d   :  { %947 = shalt.err (!%p944_p11)  }
 0x16e   :  { %s948_s21 = scalar_lea.vmem %s1299_s9, 16  ;;  %p953_p13 = scmp.lt.s32.totalorder %s1299_s9, %s1061_s28 }
 0x16f   :  { %p949_p12 = scmp.ne.s32.totalorder %s1299_s9, %s948_s21  ;;  %p954_p0 = scmp.lt.s32.totalorder %s1087_s20, %s948_s21 }
 0x171   :  { %p955_p1 = por %p954_p0, %p953_p13 }
 0x173   :  { %p956_p3 = pnand %p955_p1, %p949_p12 }
 0x175   :  { %959 = shalt.err (!%p956_p3)  }
 0x176   :  { %271 = dma.hbm_to_vmem [thread:$0]  %s259_s19, 16, %s1299_s9, [#allocation2] }
 0x177   :  { %s487_s2 = sld [smem:[#allocation5 + $0x2]]  ;;  %s1329_s16 = sld [smem:[#allocation5 + $0x3]] }
 0x178   :  { %s1331_s18 = sld [smem:[#allocation5 + $0x4]]  ;;  %s1333_s0 = sld [smem:[#allocation5 + $0x5]] }
 0x179   :  { %s1335_s25 = sld [smem:[#allocation5 + $0x6]]  ;;  %s1337_s26 = sld [smem:[#allocation5 + $0x7]] }
 0x17a   :  { %s1339_s27 = sld [smem:[#allocation5 + $0x8]]  ;;  %s1341_s29 = sld [smem:[#allocation5 + $0x9]] }
 0x17b   :  { %s1343_s1 = sld [smem:[#allocation5 + $0xa]]  ;;  %s1345_s4 = sld [smem:[#allocation5 + $0xb]] }
 0x17c   :  { %s1347_s9 = sld [smem:[#allocation5 + $0xc]]  ;;  %s1349_s10 = sld [smem:[#allocation5 + $0xd]] }
 0x17d   :  { %s1351_s5 = sld [smem:[#allocation5 + $0xe]]  ;;  %s1353_s8 = sld [smem:[#allocation5 + $0xf]] }
 0x17e   :  { %984 = dma.done.wait [#allocation2], 256 }
 0x17f   :  { %985 = vsyncadd [#allocation2], 4294967040  ;;  %p501_p4 = scmp.ne.s32.totalorder %s1312_s13, 0 }
 0x180   :  { %v1006_v0 = vmov (!%p501_p4), 0.0  }
 0x181   :  { %324 = sbr.rel (%p501_p4) target bundleno = 392 (0x188), region = 69  ;;  %325 = vst [vmem:[#allocation6] sm:$0x1] (!%p501_p4), %v1006_v0 }
 0x188 PF:  { %p502_p5 = scmp.ne.s32.totalorder %s1317_s6, 0 }
 0x189   :  { %v1007_v1 = vmov (!%p502_p5), 0.0  }
 0x18a   :  { %329 = sbr.rel (%p502_p5) target bundleno = 401 (0x191), region = 73  ;;  %330 = vst [vmem:[#allocation6 + $0x1] sm:$0x1] (!%p502_p5), %v1007_v1 }
 0x191 PF:  { %p503_p6 = scmp.ne.s32.totalorder %s487_s2, 0 }
 0x192   :  { %v1008_v2 = vmov (!%p503_p6), 0.0  }
 0x193   :  { %334 = sbr.rel (%p503_p6) target bundleno = 410 (0x19a), region = 77  ;;  %335 = vst [vmem:[#allocation6 + $0x2] sm:$0x1] (!%p503_p6), %v1008_v2 }
 0x19a PF:  { %p504_p7 = scmp.ne.s32.totalorder %s1329_s16, 0 }
 0x19b   :  { %v1009_v3 = vmov (!%p504_p7), 0.0  }
 0x19c   :  { %339 = sbr.rel (%p504_p7) target bundleno = 419 (0x1a3), region = 81  ;;  %340 = vst [vmem:[#allocation6 + $0x3] sm:$0x1] (!%p504_p7), %v1009_v3 }
 0x1a3 PF:  { %p505_p8 = scmp.ne.s32.totalorder %s1331_s18, 0 }
 0x1a4   :  { %v1010_v4 = vmov (!%p505_p8), 0.0  }
 0x1a5   :  { %344 = sbr.rel (%p505_p8) target bundleno = 428 (0x1ac), region = 85  ;;  %345 = vst [vmem:[#allocation6 + $0x4] sm:$0x1] (!%p505_p8), %v1010_v4 }
 0x1ac PF:  { %p506_p9 = scmp.ne.s32.totalorder %s1333_s0, 0 }
 0x1ad   :  { %v1011_v5 = vmov (!%p506_p9), 0.0  }
 0x1ae   :  { %349 = sbr.rel (%p506_p9) target bundleno = 437 (0x1b5), region = 89  ;;  %350 = vst [vmem:[#allocation6 + $0x5] sm:$0x1] (!%p506_p9), %v1011_v5 }
 0x1b5 PF:  { %p507_p10 = scmp.ne.s32.totalorder %s1335_s25, 0 }
 0x1b6   :  { %v1012_v6 = vmov (!%p507_p10), 0.0  }
 0x1b7   :  { %354 = sbr.rel (%p507_p10) target bundleno = 446 (0x1be), region = 93  ;;  %355 = vst [vmem:[#allocation6 + $0x6] sm:$0x1] (!%p507_p10), %v1012_v6 }
 0x1be PF:  { %p508_p11 = scmp.ne.s32.totalorder %s1337_s26, 0 }
 0x1bf   :  { %v1013_v7 = vmov (!%p508_p11), 0.0  }
 0x1c0   :  { %359 = sbr.rel (%p508_p11) target bundleno = 455 (0x1c7), region = 97  ;;  %360 = vst [vmem:[#allocation6 + $0x7] sm:$0x1] (!%p508_p11), %v1013_v7 }
 0x1c7 PF:  { %p509_p12 = scmp.ne.s32.totalorder %s1339_s27, 0 }
 0x1c8   :  { %v1014_v8 = vmov (!%p509_p12), 0.0  }
 0x1c9   :  { %364 = sbr.rel (%p509_p12) target bundleno = 464 (0x1d0), region = 101  ;;  %365 = vst [vmem:[#allocation6 + $0x8] sm:$0x1] (!%p509_p12), %v1014_v8 }
 0x1d0 PF:  { %p510_p13 = scmp.ne.s32.totalorder %s1341_s29, 0 }
 0x1d1   :  { %v1015_v9 = vmov (!%p510_p13), 0.0  }
 0x1d2   :  { %369 = sbr.rel (%p510_p13) target bundleno = 473 (0x1d9), region = 105  ;;  %370 = vst [vmem:[#allocation6 + $0x9] sm:$0x1] (!%p510_p13), %v1015_v9 }
 0x1d9 PF:  { %p511_p0 = scmp.ne.s32.totalorder %s1343_s1, 0 }
 0x1da   :  { %v1016_v10 = vmov (!%p511_p0), 0.0  }
 0x1db   :  { %374 = sbr.rel (%p511_p0) target bundleno = 482 (0x1e2), region = 109  ;;  %375 = vst [vmem:[#allocation6 + $0xa] sm:$0x1] (!%p511_p0), %v1016_v10 }
 0x1e2 PF:  { %p512_p1 = scmp.ne.s32.totalorder %s1345_s4, 0 }
 0x1e3   :  { %v1017_v11 = vmov (!%p512_p1), 0.0  }
 0x1e4   :  { %379 = sbr.rel (%p512_p1) target bundleno = 491 (0x1eb), region = 113  ;;  %380 = vst [vmem:[#allocation6 + $0xb] sm:$0x1] (!%p512_p1), %v1017_v11 }
 0x1eb PF:  { %p513_p3 = scmp.ne.s32.totalorder %s1347_s9, 0 }
 0x1ec   :  { %v1018_v12 = vmov (!%p513_p3), 0.0  }
 0x1ed   :  { %384 = sbr.rel (%p513_p3) target bundleno = 500 (0x1f4), region = 117  ;;  %385 = vst [vmem:[#allocation6 + $0xc] sm:$0x1] (!%p513_p3), %v1018_v12 }
 0x1f4 PF:  { %p514_p4 = scmp.ne.s32.totalorder %s1349_s10, 0 }
 0x1f5   :  { %v1019_v13 = vmov (!%p514_p4), 0.0  }
 0x1f6   :  { %389 = sbr.rel (%p514_p4) target bundleno = 509 (0x1fd), region = 121  ;;  %390 = vst [vmem:[#allocation6 + $0xd] sm:$0x1] (!%p514_p4), %v1019_v13 }
 0x1fd PF:  { %p515_p5 = scmp.ne.s32.totalorder %s1351_s5, 0 }
 0x1fe   :  { %v1020_v14 = vmov (!%p515_p5), 0.0  }
 0x1ff   :  { %394 = sbr.rel (%p515_p5) target bundleno = 518 (0x206), region = 125  ;;  %395 = vst [vmem:[#allocation6 + $0xe] sm:$0x1] (!%p515_p5), %v1020_v14 }
 0x206 PF:  { %p516_p6 = scmp.ne.s32.totalorder %s1353_s8, 0 }
 0x207   :  { %v1021_v15 = vmov (!%p516_p6), 0.0  }
 0x208   :  { %399 = sbr.rel (%p516_p6) target bundleno = 527 (0x20f), region = 129  ;;  %400 = vst [vmem:[#allocation6 + $0xf] sm:$0x1] (!%p516_p6), %v1021_v15 }
 0x20f PF:  { %p961_p7 = scmp.ne.s32.totalorder %s1061_s28, %s1087_s20  ;;  %p966_p8 = scmp.lt.s32.totalorder %s1087_s20, %s1087_s20 }
 0x211   :  { %p967_p9 = por %p966_p8, %p593_p2 }
 0x213   :  { %p968_p10 = pnand %p967_p9, %p961_p7 }
 0x215   :  { %971 = shalt.err (!%p968_p10)
}
 0x216   :  { %s972_s12 = scalar_lea.hbm %s1392_s3, 256 }
 0x217   :  { %p973_p11 = scmp.ne.s32.totalorder %s1392_s3, %s972_s12  ;;  %p976_p12 = scmp.lt.u32.totalorder %s972_s12, %s1392_s3 }
 0x219   :  { %p978_p13 = pnand %p976_p12, %p973_p11 }
 0x21b   :  { %981 = shalt.err (!%p978_p13)
}
 0x21c   :  { %s1022_s17 = smov 128   ;;  %s1023_s20 = smov 8  }
 0x21d   :  { %412 = dma.vmem_to_hbm [thread:$0]  %s1061_s28, 256, %s1392_s3, [#allocation7], %s1022_s17, %s1022_s17, %s1023_s20  }
 0x21e   :  { %986 = dma.done.wait [#allocation7], 256  }
 0x21f   :  { %987 = vsyncadd [#allocation7], 4294967040 }
 0x220   :  { %416 = vsyncpa [#allocation7], 1 }
 0x221   :  { %417 = vsyncmov [#allocation2] }
 0x224   :  { %s418_s22 = vpop.sfrf %417 }
 0x225   :  { %p517_p2 = scmp.ne.s32.totalorder %s418_s22, 0 }
 0x227   :  { %422 = shalt.err (%p517_p2)  }

</bundles_post_ra>
